<compile_context>
chip_gen: v6e
topology: v6e:2x2x1
jax: 0.10.0
libtpu: 0.0.40
codegen_flags: <defaults>
</compile_context>

<pallas_src>
import jax
import jax.numpy as jnp
from jax.experimental import pallas as pl
from jax.experimental.pallas import tpu as pltpu


def _round_up(n, m):
    return (n + m - 1) // m * m


def _pack_layout(input_dim, param_dim, hyper_hidden, h1, h2):
    """Row layout of the single packed (rows, 128) f32 parameter slab.

    Every entry starts at a sublane-aligned (multiple-of-8) row offset, lane 0.
    hw1e is the hyper-net first weight zero-extended to (input_dim + param_dim, hh):
    rows [0:input_dim] are zero (x lanes), rows [input_dim:] hold hw1, so the merged
    [x | B] tile can be fed to it directly (xB @ hw1e == B @ hw1).
    """
    feat = input_dim + param_dim
    entries = [
        ("hw1e", feat, hyper_hidden),
        ("hb1", 1, hyper_hidden),
        ("hw2", hyper_hidden, input_dim),
        ("hb2", 1, input_dim),
        ("w1", input_dim, h1),
        ("b1", 1, h1),
        ("w2", h1, h2),
        ("b2", 1, h2),
        ("w3", h2, 1),
        ("b3", 1, 1),
    ]
    layout = {}
    off = 0
    for name, r, c in entries:
        layout[name] = (off, r, c)
        off += _round_up(r, 8)
    width = _round_up(max(c for _, _, c in entries), 128)
    total_rows = _round_up(off, 8)
    return layout, total_rows, width


def _pack_params(params, layout, total_rows, width, input_dim):
    packed = jnp.zeros((total_rows, width), jnp.float32)

    def put(buf, name, val, row_shift=0):
        off, _, _ = layout[name]
        v = jnp.asarray(val, jnp.float32)
        return buf.at[off + row_shift: off + row_shift + v.shape[0], 0:v.shape[1]].set(v)

    packed = put(packed, "hw1e", params["hw1"], row_shift=input_dim)  # x-lane rows stay 0
    packed = put(packed, "hb1", params["hb1"])
    packed = put(packed, "hw2", params["hw2"])
    packed = put(packed, "hb2", params["hb2"])
    packed = put(packed, "w1", params["w1"])
    packed = put(packed, "b1", params["b1"])
    packed = put(packed, "w2", params["w2"])
    packed = put(packed, "b2", params["b2"])
    packed = put(packed, "w3", params["w3"])
    packed = put(packed, "b3", params["b3"])
    return packed


def _make_fc_stg_kernel(layout, input_dim):
    def slc(p_ref, name):
        off, r, c = layout[name]
        return p_ref[off:off + r, 0:c]  # static, sublane-aligned slice of resident weights

    def kernel(xB_ref, p_ref, out_ref):
        f32 = jnp.float32
        xB = xB_ref[...]                                     # (tile, feat), bf16 or f32

        # ---- hyper-network: gate = hard_sigmoid(sigmoid(relu(B@hw1+hb1)@hw2+hb2)) ----
        # hw1e's x-lane rows are zero, so xB @ hw1e == B @ hw1; cast the tiny weight to
        # the input dtype so bf16 inputs hit the MXU's native bf16xbf16->f32 mode.
        hw1e = slc(p_ref, "hw1e").astype(xB.dtype)
        h = jnp.dot(xB, hw1e, preferred_element_type=f32) + slc(p_ref, "hb1")
        h = jnp.maximum(h, 0.0)
        mu = jnp.dot(h, slc(p_ref, "hw2"), preferred_element_type=f32) + slc(p_ref, "hb2")
        # eval mode: z = mu + sigma * noise * training == mu; hard_sigmoid = clamp(0,1)
        gate = jnp.clip(jax.nn.sigmoid(mu), 0.0, 1.0)        # clamp ~free, kept for fidelity

        # ---- feature gating + main MLP (x occupies lanes [0:input_dim], lane-0 aligned) ----
        xg = xB[:, 0:input_dim].astype(f32) * gate
        h1 = jnp.maximum(
            jnp.dot(xg, slc(p_ref, "w1"), preferred_element_type=f32) + slc(p_ref, "b1"), 0.0)
        h2 = jnp.maximum(
            jnp.dot(h1, slc(p_ref, "w2"), preferred_element_type=f32) + slc(p_ref, "b2"), 0.0)

        # ---- sigmoid head, output_dim == 1: (tile, 1) column, no relayout ----
        logits = jnp.dot(h2, slc(p_ref, "w3"), preferred_element_type=f32) + slc(p_ref, "b3")
        out_ref[...] = jax.nn.sigmoid(logits)

    return kernel


def fc_stg_forward(x, B, params, *, tile_b=4096, dtype=jnp.bfloat16):
    """x: (batch, input_dim); B: (batch, param_dim). Returns (batch, 1) float32.

    tile_b: batch-tile cap (sweep {2048, 4096, 8192}; ~4096 is a safe cap for v7x VMEM).
    dtype:  storage/DMA dtype for the merged [x|B] input (bf16 halves HBM traffic);
            all in-kernel elementwise math stays float32.
    """
    batch, input_dim = x.shape
    param_dim = B.shape[1]
    hyper_hidden = params["hw1"].shape[1]
    h1 = params["w1"].shape[1]
    h2 = params["w2"].shape[1]
    # TODO(synk): output_dim > 1 (Softmax head) is not implemented; this kernel
    # specializes the classification + output_dim == 1 (Sigmoid head) configuration.
    assert params["w3"].shape[1] == 1

    feat = input_dim + param_dim
    layout, total_rows, width = _pack_layout(input_dim, param_dim, hyper_hidden, h1, h2)
    packed = _pack_params(params, layout, total_rows, width, input_dim)

    # ---- batch tiling: multiple of 8 (sublane), capped, >= 2 grid steps when possible ----
    batch8 = _round_up(batch, 8)
    cap = max(8, _round_up(tile_b, 8))
    if batch8 >= 16:
        tile = min(cap, _round_up((batch8 + 1) // 2, 8))   # guarantees >= 2 steps (v7x TCs)
    else:
        tile = batch8
    num_tiles = pl.cdiv(batch8, tile)
    batch_padded = num_tiles * tile

    # ---- single merged [x | B] input (one DMA per step); pad only the tail tile ----
    xd = x.astype(dtype)
    Bd = B.astype(dtype)
    if batch_padded == batch:
        xB = jnp.concatenate([xd, Bd], axis=1)
    else:
        xB = jnp.zeros((batch_padded, feat), dtype)
        xB = xB.at[:batch, :input_dim].set(xd)
        xB = xB.at[:batch, input_dim:].set(Bd)

    out = pl.pallas_call(
        _make_fc_stg_kernel(layout, input_dim),
        out_shape=jax.ShapeDtypeStruct((batch_padded, 1), jnp.float32),
        grid=(num_tiles,),
        in_specs=[
            pl.BlockSpec((tile, feat), lambda i: (i, 0)),
            pl.BlockSpec((total_rows, width), lambda i: (0, 0)),  # VMEM-resident weights
        ],
        out_specs=pl.BlockSpec((tile, 1), lambda i: (i, 0)),
        compiler_params=pltpu.CompilerParams(
            dimension_semantics=("parallel",),            # shard batch tiles across TCs
            vmem_limit_bytes=48 * 1024 * 1024,            # headroom for big tiles on v5e too
        ),
    )(xB, packed)

    return out[:batch]


def init_params(key, input_dim, param_dim, hyper_hidden, hidden, output_dim):
    """Deterministic synthetic init (matches module shapes, not a checkpoint)."""
    ks = jax.random.split(key, 10)

    def lin(kw, kb, fan_in, fan_out):
        # PyTorch nn.Linear-style uniform(-1/sqrt(fan_in), 1/sqrt(fan_in))
        bound = 1.0 / jnp.sqrt(jnp.float32(fan_in))
        w = jax.random.uniform(kw, (fan_in, fan_out), jnp.float32, -bound, bound)
        b = jax.random.uniform(kb, (1, fan_out), jnp.float32, -bound, bound)
        return w, b

    hw1, hb1 = lin(ks[0], ks[1], param_dim, hyper_hidden)
    hw2, hb2 = lin(ks[2], ks[3], hyper_hidden, input_dim)
    w1, b1 = lin(ks[4], ks[5], input_dim, hidden[0])
    w2, b2 = lin(ks[6], ks[7], hidden[0], hidden[1])
    w3, b3 = lin(ks[8], ks[9], hidden[1], output_dim)
    return dict(hw1=hw1, hb1=hb1, hw2=hw2, hb2=hb2,
                w1=w1, b1=b1, w2=w2, b2=b2, w3=w3, b3=b3)


def _reference(x, B, p):
    """Pure-JAX reference mirroring the PyTorch module in eval mode."""
    h = jnp.maximum(B @ p["hw1"] + p["hb1"], 0.0)
    mu = jax.nn.sigmoid(h @ p["hw2"] + p["hb2"])
    gate = jnp.clip(mu, 0.0, 1.0)          # hard_sigmoid; noise term is 0 in eval
    xg = x * gate
    h1 = jnp.maximum(xg @ p["w1"] + p["b1"], 0.0)
    h2 = jnp.maximum(h1 @ p["w2"] + p["b2"], 0.0)
    return jax.nn.sigmoid(h2 @ p["w3"] + p["b3"])


if __name__ == "__main__":
    # Small shapes consistent with the module's forward:
    batch, input_dim, param_dim = 300, 16, 8   # 300 exercises >=2 tiles + tail padding
    hyper_hidden_dim = 32                      # hyper_hidden_dim = [32]
    hidden_dim = (64, 32)                      # hidden_dim = [64, 32]
    output_dim = 1                             # classification + output_dim==1 -> Sigmoid head

    key = jax.random.PRNGKey(0)
    kx, kB, kp = jax.random.split(key, 3)
    x = jax.random.normal(kx, (batch, input_dim), jnp.float32)
    B = jax.random.normal(kB, (batch, param_dim), jnp.float32)
    params = init_params(kp, input_dim, param_dim, hyper_hidden_dim,
                         hidden_dim, output_dim)

    ref = _reference(x, B, params)

    # Strict check on the f32 input path.
    out_f32 = jax.block_until_ready(fc_stg_forward(x, B, params, dtype=jnp.float32))
    assert out_f32.shape == (batch, output_dim)
    assert jnp.allclose(out_f32, ref, atol=1e-4, rtol=1e-4), "f32 mismatch vs reference"

    # Default bf16-input path (halved HBM traffic); bf16-rounded inputs => looser tol.
    out_bf16 = jax.block_until_ready(fc_stg_forward(x, B, params))
    assert out_bf16.shape == (batch, output_dim)
    assert jnp.allclose(out_bf16, ref, atol=3e-2, rtol=3e-2), "bf16 mismatch vs reference"

    print("KERNEL_OK")
</pallas_src>

<mosaic_0001>
module attributes {stable_mosaic.version = 11 : i64} {
  func.func @kernel(%arg0: i32, %arg1: memref<152x24xf32, #tpu.memory_space<vmem>>, %arg2: memref<208x128xf32, #tpu.memory_space<vmem>>, %arg3: memref<152x1xf32, #tpu.memory_space<vmem>>) attributes {dimension_semantics = [#tpu.dimension_semantics<parallel>], iteration_bounds = array<i64: 2>, scalar_prefetch = 0 : i64, scratch_operands = 0 : i64, tpu.core_type = #tpu.core_type<tc>, window_params = [{transform_indices = @transform_0, window_bounds = array<i64: 152, 24>}, {pipeline_mode = #tpu.pipeline_mode<synchronous>, transform_indices = @transform_1, window_bounds = array<i64: 208, 128>}, {transform_indices = @transform_2, window_bounds = array<i64: 152, 1>}]} {
    %c0 = arith.constant 0 : index
    %c0_0 = arith.constant 0 : index
    %0 = vector.load %arg1[%c0, %c0_0] : memref<152x24xf32, #tpu.memory_space<vmem>>, vector<152x24xf32>
    %c0_1 = arith.constant 0 : index
    %c0_2 = arith.constant 0 : index
    %1 = vector.load %arg2[%c0_1, %c0_2] : memref<208x128xf32, #tpu.memory_space<vmem>>, vector<24x32xf32>
    %cst = arith.constant dense<0.000000e+00> : vector<152x32xf32>
    %2 = tpu.matmul %0, %1, %cst {dimension_numbers = #tpu.dot_dimension_numbers<[1], [0], [0], [1], [0, 0, 1, 1], [], []>} : vector<152x24xf32>, vector<24x32xf32>, vector<152x32xf32> -> vector<152x32xf32>
    %c24 = arith.constant 24 : index
    %c0_3 = arith.constant 0 : index
    %3 = vector.load %arg2[%c24, %c0_3] : memref<208x128xf32, #tpu.memory_space<vmem>>, vector<1x32xf32>
    %4 = vector.broadcast %3 : vector<1x32xf32> to vector<152x32xf32>
    %5 = arith.addf %2, %4 : vector<152x32xf32>
    %cst_4 = arith.constant 0.000000e+00 : f32
    %6 = vector.broadcast %cst_4 : f32 to vector<152x32xf32>
    %7 = arith.maximumf %5, %6 : vector<152x32xf32>
    %c32 = arith.constant 32 : index
    %c0_5 = arith.constant 0 : index
    %8 = vector.load %arg2[%c32, %c0_5] : memref<208x128xf32, #tpu.memory_space<vmem>>, vector<32x16xf32>
    %cst_6 = arith.constant dense<0.000000e+00> : vector<152x16xf32>
    %9 = tpu.matmul %7, %8, %cst_6 {dimension_numbers = #tpu.dot_dimension_numbers<[1], [0], [0], [1], [0, 0, 1, 1], [], []>} : vector<152x32xf32>, vector<32x16xf32>, vector<152x16xf32> -> vector<152x16xf32>
    %c64 = arith.constant 64 : index
    %c0_7 = arith.constant 0 : index
    %10 = vector.load %arg2[%c64, %c0_7] : memref<208x128xf32, #tpu.memory_space<vmem>>, vector<1x16xf32>
    %11 = vector.broadcast %10 : vector<1x16xf32> to vector<152x16xf32>
    %12 = arith.addf %9, %11 : vector<152x16xf32>
    %13 = arith.negf %12 : vector<152x16xf32>
    %14 = math.exp %13 : vector<152x16xf32>
    %cst_8 = arith.constant 1.000000e+00 : f32
    %15 = vector.broadcast %cst_8 : f32 to vector<152x16xf32>
    %16 = arith.addf %15, %14 : vector<152x16xf32>
    %17 = arith.divf %15, %16 : vector<152x16xf32>
    %cst_9 = arith.constant 0.000000e+00 : f32
    %cst_10 = arith.constant 1.000000e+00 : f32
    %18 = vector.broadcast %cst_9 : f32 to vector<152x16xf32>
    %19 = arith.maximumf %18, %17 : vector<152x16xf32>
    %20 = vector.broadcast %cst_10 : f32 to vector<152x16xf32>
    %21 = arith.minimumf %20, %19 : vector<152x16xf32>
    %22 = vector.extract_strided_slice %0 {offsets = [0, 0], sizes = [152, 16], strides = [1, 1]} : vector<152x24xf32> to vector<152x16xf32>
    %23 = arith.mulf %22, %21 : vector<152x16xf32>
    %c72 = arith.constant 72 : index
    %c0_11 = arith.constant 0 : index
    %24 = vector.load %arg2[%c72, %c0_11] : memref<208x128xf32, #tpu.memory_space<vmem>>, vector<16x64xf32>
    %cst_12 = arith.constant dense<0.000000e+00> : vector<152x64xf32>
    %25 = tpu.matmul %23, %24, %cst_12 {dimension_numbers = #tpu.dot_dimension_numbers<[1], [0], [0], [1], [0, 0, 1, 1], [], []>} : vector<152x16xf32>, vector<16x64xf32>, vector<152x64xf32> -> vector<152x64xf32>
    %c88 = arith.constant 88 : index
    %c0_13 = arith.constant 0 : index
    %26 = vector.load %arg2[%c88, %c0_13] : memref<208x128xf32, #tpu.memory_space<vmem>>, vector<1x64xf32>
    %27 = vector.broadcast %26 : vector<1x64xf32> to vector<152x64xf32>
    %28 = arith.addf %25, %27 : vector<152x64xf32>
    %cst_14 = arith.constant 0.000000e+00 : f32
    %29 = vector.broadcast %cst_14 : f32 to vector<152x64xf32>
    %30 = arith.maximumf %28, %29 : vector<152x64xf32>
    %c96 = arith.constant 96 : index
    %c0_15 = arith.constant 0 : index
    %31 = vector.load %arg2[%c96, %c0_15] : memref<208x128xf32, #tpu.memory_space<vmem>>, vector<64x32xf32>
    %cst_16 = arith.constant dense<0.000000e+00> : vector<152x32xf32>
    %32 = tpu.matmul %30, %31, %cst_16 {dimension_numbers = #tpu.dot_dimension_numbers<[1], [0], [0], [1], [0, 0, 1, 1], [], []>} : vector<152x64xf32>, vector<64x32xf32>, vector<152x32xf32> -> vector<152x32xf32>
    %c160 = arith.constant 160 : index
    %c0_17 = arith.constant 0 : index
    %33 = vector.load %arg2[%c160, %c0_17] : memref<208x128xf32, #tpu.memory_space<vmem>>, vector<1x32xf32>
    %34 = vector.broadcast %33 : vector<1x32xf32> to vector<152x32xf32>
    %35 = arith.addf %32, %34 : vector<152x32xf32>
    %cst_18 = arith.constant 0.000000e+00 : f32
    %36 = vector.broadcast %cst_18 : f32 to vector<152x32xf32>
    %37 = arith.maximumf %35, %36 : vector<152x32xf32>
    %c168 = arith.constant 168 : index
    %c0_19 = arith.constant 0 : index
    %38 = vector.load %arg2[%c168, %c0_19] : memref<208x128xf32, #tpu.memory_space<vmem>>, vector<32x1xf32>
    %cst_20 = arith.constant dense<0.000000e+00> : vector<152x1xf32>
    %39 = tpu.matmul %37, %38, %cst_20 {dimension_numbers = #tpu.dot_dimension_numbers<[1], [0], [0], [1], [0, 0, 1, 1], [], []>} : vector<152x32xf32>, vector<32x1xf32>, vector<152x1xf32> -> vector<152x1xf32>
    %c200 = arith.constant 200 : index
    %c0_21 = arith.constant 0 : index
    %40 = vector.load %arg2[%c200, %c0_21] : memref<208x128xf32, #tpu.memory_space<vmem>>, vector<1x1xf32>
    %41 = vector.broadcast %40 : vector<1x1xf32> to vector<152x1xf32>
    %42 = arith.addf %39, %41 : vector<152x1xf32>
    %43 = arith.negf %42 : vector<152x1xf32>
    %44 = math.exp %43 : vector<152x1xf32>
    %cst_22 = arith.constant 1.000000e+00 : f32
    %45 = vector.broadcast %cst_22 : f32 to vector<152x1xf32>
    %46 = arith.addf %45, %44 : vector<152x1xf32>
    %47 = arith.divf %45, %46 : vector<152x1xf32>
    %c0_23 = arith.constant 0 : index
    %c0_24 = arith.constant 0 : index
    %48 = vector.load %arg3[%c0_23, %c0_24] : memref<152x1xf32, #tpu.memory_space<vmem>>, vector<152x1xf32>
    tpu.vector_store %arg3[%c0_23, %c0_24], %47 {strides = array<i32>} : memref<152x1xf32, #tpu.memory_space<vmem>>, vector<152x1xf32>,
    return
  }
  func.func @transform_0(%arg0: i32) -> (i32, i32) {
    %c0_i32 = arith.constant 0 : i32
    %c0_i32_0 = arith.constant 0 : i32
    return %arg0, %c0_i32 : i32, i32
  }
  func.func @transform_1(%arg0: i32) -> (i32, i32) {
    %c0_i32 = arith.constant 0 : i32
    %c0_i32_0 = arith.constant 0 : i32
    %c0_i32_1 = arith.constant 0 : i32
    return %c0_i32, %c0_i32_0 : i32, i32
  }
  func.func @transform_2(%arg0: i32) -> (i32, i32) {
    %c0_i32 = arith.constant 0 : i32
    %c0_i32_0 = arith.constant 0 : i32
    return %arg0, %c0_i32 : i32, i32
  }
}

</mosaic_0001>

<bundles_post_ra>
// kernel: tpu_custom_call.1
= control target key start
LH: loop header
LB: loop body
LE: loop exit
PB: predicated region body
PF: predicated region fallthrough
CT: control target
= control target key end

     0   :  { %s2502_s9 = smov 0   ;;  %s3164_s0 = inlined_call_operand.vmem [shape: f32[304,24], index: 0, kind: input, shape index: {}]   ;;  %s3165_s1 = inlined_call_operand.vmem [shape: f32[208,128], index: 1, kind: input, shape index: {}]   ;;  %s3166_s2 = inlined_call_operand.vmem [shape: f32[304,1], index: 2, kind: output, shape index: {}]  }
   0x1 LB: > { %s1719_s10 = sadd.s32 4294967295, %s2483_s9   ;;  %p1723_p0 = scmp.ge.s32.totalorder %s2483_s9, 1  ;;  %s2483_s9 = sphi %s2502_s9, %s12_s9  }
   0x2   : > { %p113_p1 = scmp.lt.s32.totalorder %s2483_s9, 3 }
   0x4   : > { %p114_p2 = pnand %p1723_p0, %p113_p1 }
   0x5   : > { %s135_s13 = smul.u32 (!%p114_p2), 19, %s1719_s10 }
   0x6   : > { %117 = sbr.rel (%p114_p2) target bundleno = 1146 (0x47a), region = 28 }
   0x7   : > { %p136_p3 = scmp.lt.s32.totalorder (!%p114_p2), %s135_s13, 37 }
   0xb   : > { %v168_v0 = vld [vmem:[%s3165_s1 + $0x10] sm:$0xff]  ;;  %v2485_v1 = vmov 0.0   ;;  %v167_v2 = vld [vmem:[%s3165_s1 + $0x8] sm:$0xff]  ;;  %vm2486_vm0 = vmmov 0   ;;  %v166_v3 = vld [vmem:[%s3165_s1] sm:$0xff]  ;;  %s3168_s13 = smov (!%p136_p3, %s135_s13), 37 }
   0xc   : > { %1982 = vmatprep.subr.mxu0 %v2485_v1  ;;  %1988 = vmatprep.mubr.msk.f32.mxu0 %vm2486_vm0, %v2485_v1  ;;  %s1724_s18 = sshll.u32 %s3168_s13, 3  ;;  %vm174_vm1 = vcmask 195584   ;;  %v414_v7 = vld [vmem:[%s3165_s1 + $0x38] sm:$0xff]  ;;  %v413_v10 = vld [vmem:[%s3165_s1 + $0x30] sm:$0xff]  ;;  %v412_v13 = vld [vmem:[%s3165_s1 + $0x28] sm:$0xff]  ;;  %vm420_vm2 = vcmask 261120  }
   0xd   : > { %1983 = vmatpush3.msra.mxu0 %v168_v0  ;;  %2309 = vmatprep.subr.mxu1 %v2485_v1  ;;  %s2535_s21 = scalar_lea.vmem %s3164_s0, %s1724_s18  ;;  %v411_v16 = vld [vmem:[%s3165_s1 + $0x20] sm:$0xff]  ;;  %v2693_v27 = vld [vmem:[%s3165_s1 + $0x18] ss:$0 sm:$0xff]  ;;  %vm816_vm3 = vcmask 130048   ;;  %vm1066_vm4 = vcmask 523264   ;;  %s3110_s20 = scalar_lea.vmem %s3166_s2, %s1724_s18  ;;  %vm1643_vm5 = vcmask 7168  }
   0xe   : > { %1984 = vmatprep.subr.mxu0 %v2485_v1  ;;  %2312 = vmatpush3.msra.mxu1 %v168_v0  ;;  %v2540_v4 = vld [vmem:[%s2535_s21] sm:$0xff]  ;;  %v2549_v5 = vld [vmem:[%s2535_s21 + $0x8] sm:$0xff]  ;;  %v2552_v6 = vld [vmem:[%s2535_s21 + $0x50] sm:$0xff] }
   0xf   : > { %1985 = vmatpush3.msra.mxu0 %v167_v2  ;;  %2310 = vmatprep.subr.mxu1 %v2485_v1  ;;  %v2564_v8 = vld [vmem:[%s2535_s21 + $0x58] sm:$0xff]  ;;  %v2569_v9 = vld [vmem:[%s2535_s21 + $0x10] sm:$0xff]  ;;  %v2582_v11 = vld [vmem:[%s2535_s21 + $0x60] sm:$0xff] }
  0x10   : > { %1986 = vmatprep.subr.mxu0 %v2485_v1  ;;  %2313 = vmatpush3.msra.mxu1 %v167_v2  ;;  %v2587_v12 = vld [vmem:[%s2535_s21 + $0x18] sm:$0xff]  ;;  %v2600_v14 = vld [vmem:[%s2535_s21 + $0x68] sm:$0xff]  ;;  %v2605_v15 = vld [vmem:[%s2535_s21 + $0x20] sm:$0xff] }
  0x11   : > { %1987 = vmatpush3.msra.mxu0 %v166_v3  ;;  %2311 = vmatprep.subr.mxu1 %v2485_v1  ;;  %v2618_v17 = vld [vmem:[%s2535_s21 + $0x70] sm:$0xff]  ;;  %v2623_v18 = vld [vmem:[%s2535_s21 + $0x28] sm:$0xff]  ;;  %v2633_v19 = vld [vmem:[%s2535_s21 + $0x78] sm:$0xff] }
  0x12   : > { %2314 = vmatpush3.msra.mxu1 %v166_v3  ;;  %2018 = vmatprep.mubr.msk.f32.mxu1 %vm2486_vm0, %v2485_v1  ;;  %v2638_v20 = vld [vmem:[%s2535_s21 + $0x30] sm:$0xff]  ;;  %v2647_v21 = vld [vmem:[%s2535_s21 + $0x80] sm:$0xff]  ;;  %v2652_v22 = vld [vmem:[%s2535_s21 + $0x38] sm:$0xff] }
  0x13   : > { %2045 = vmatprep.subr.mxu1 %v2485_v1  ;;  %2110 = vmatprep.subr.mxu0 %v2485_v1  ;;  %v2661_v23 = vld [vmem:[%s2535_s21 + $0x88] sm:$0xff]  ;;  %v2666_v24 = vld [vmem:[%s2535_s21 + $0x40] sm:$0xff]  ;;  %v2675_v25 = vld [vmem:[%s2535_s21 + $0x90] sm:$0xff] }
  0x14   : > { %1989 = vmatmul.mubr.msk.f32.vlgmr.msra.gmra.mxu0 %vm174_vm1, %v2540_v4  ;;  %2019 = vmatmul.mubr.msk.f32.vlgmr.msra.gmra.mxu1 %vm174_vm1, %v2552_v6  ;;  %v2680_v26 = vld [vmem:[%s2535_s21 + $0x48] sm:$0xff] }
  0x15   : > { %1991 = vmatprep.mubr.msk.f32.mxu0 %vm2486_vm0, %v2485_v1  ;;  %2021 = vmatprep.mubr.msk.f32.mxu1 %vm2486_vm0, %v2485_v1 }
  0x16   : > { %2046 = vmatpush3.msra.mxu1 %v414_v7 }
  0x17   : > { %2047 = vmatprep.subr.mxu1 %v2485_v1 }
  0x18   : > { %1992 = vmatmul.mubr.msk.f32.gmra.mxu0 %vm174_vm1, %v2549_v5  ;;  %2022 = vmatmul.mubr.msk.f32.gmra.mxu1 %vm174_vm1, %v2564_v8 }
  0x19   : > { %1994 = vmatprep.mubr.msk.f32.mxu0 %vm2486_vm0, %v2485_v1  ;;  %2024 = vmatprep.mubr.msk.f32.mxu1 %vm2486_vm0, %v2485_v1 }
  0x1a   : > { %2048 = vmatpush3.msra.mxu1 %v413_v10 }
  0x1b   : > { %2049 = vmatprep.subr.mxu1 %v2485_v1 }
  0x1c   : > { %1995 = vmatmul.mubr.msk.f32.gmra.mxu0 %vm174_vm1, %v2569_v9  ;;  %2025 = vmatmul.mubr.msk.f32.gmra.mxu1 %vm174_vm1, %v2582_v11 }
  0x1d   : > { %1997 = vmatprep.mubr.msk.f32.mxu0 %vm2486_vm0, %v2485_v1  ;;  %2027 = vmatprep.mubr.msk.f32.mxu1 %vm2486_vm0, %v2485_v1 }
  0x1e   : > { %2050 = vmatpush3.msra.mxu1 %v412_v13 }
  0x1f   : > { %2051 = vmatprep.subr.mxu1 %v2485_v1 }
  0x20   : > { %1998 = vmatmul.mubr.msk.f32.gmra.mxu0 %vm174_vm1, %v2587_v12  ;;  %2028 = vmatmul.mubr.msk.f32.gmra.mxu1 %vm174_vm1, %v2600_v14 }
  0x21   : > { %2000 = vmatprep.mubr.msk.f32.mxu0 %vm2486_vm0, %v2485_v1  ;;  %2030 = vmatprep.mubr.msk.f32.mxu1 %vm2486_vm0, %v2485_v1 }
  0x22   : > { %2052 = vmatpush3.msra.mxu1 %v411_v16 }
  0x23   : > { %2171 = vmatprep.subr.mxu1 %v2485_v1 }
  0x24   : > { %2001 = vmatmul.mubr.msk.f32.gmra.mxu0 %vm174_vm1, %v2605_v15  ;;  %2031 = vmatmul.mubr.msk.f32.gmra.mxu1 %vm174_vm1, %v2618_v17 }
  0x25   : > { %2003 = vmatprep.mubr.msk.f32.mxu0 %vm2486_vm0, %v2485_v1  ;;  %2033 = vmatprep.mubr.msk.f32.mxu1 %vm2486_vm0, %v2485_v1 }
  0x28   : > { %2004 = vmatmul.mubr.msk.f32.gmra.mxu0 %vm174_vm1, %v2623_v18  ;;  %2034 = vmatmul.mubr.msk.f32.gmra.mxu1 %vm174_vm1, %v2633_v19 }
  0x29   : > { %2006 = vmatprep.mubr.msk.f32.mxu0 %vm2486_vm0, %v2485_v1  ;;  %2036 = vmatprep.mubr.msk.f32.mxu1 %vm2486_vm0, %v2485_v1 }
  0x2c   : > { %2007 = vmatmul.mubr.msk.f32.gmra.mxu0 %vm174_vm1, %v2638_v20  ;;  %2037 = vmatmul.mubr.msk.f32.gmra.mxu1 %vm174_vm1, %v2647_v21 }
  0x2d   : > { %2009 = vmatprep.mubr.msk.f32.mxu0 %vm2486_vm0, %v2485_v1  ;;  %2039 = vmatprep.mubr.msk.f32.mxu1 %vm2486_vm0, %v2485_v1 }
  0x30   : > { %2010 = vmatmul.mubr.msk.f32.gmra.mxu0 %vm174_vm1, %v2652_v22  ;;  %2040 = vmatmul.mubr.msk.f32.gmra.mxu1 %vm174_vm1, %v2661_v23 }
  0x31   : > { %2012 = vmatprep.mubr.msk.f32.mxu0 %vm2486_vm0, %v2485_v1  ;;  %2042 = vmatprep.mubr.msk.f32.mxu1 %vm2486_vm0, %v2485_v1 }
  0x34   : > { %2013 = vmatmul.mubr.msk.f32.gmra.mxu0 %vm174_vm1, %v2666_v24  ;;  %2043 = vmatmul.mubr.msk.f32.gmra.mxu1 %vm174_vm1, %v2675_v25 }
  0x35   : > { %2015 = vmatprep.mubr.msk.f32.mxu0 %vm2486_vm0, %v2485_v1  ;;  %2053 = vmatprep.mubr.msk.f32.mxu1 %vm2486_vm0, %v2485_v1 }
  0x38   : > { %2016 = vmatmul.mubr.msk.f32.gmra.mxu0 %vm174_vm1, %v2680_v26 }
  0x39   : > { %2114 = vmatprep.mubr.msk.f32.mxu0 %vm2486_vm0, %v2485_v1 }
  0xd4   : > { %v298_v28 = vpop.f32.mrf.mxu0  ;;  %v2696_v32 = vpop.f32.mrf.mxu1 }
  0xd5   : > { %v299_v29 = vadd.f32 %v2693_v27, %v298_v28 }
  0xd6   : > { %v1990_v30 = vpop.f32.mrf.mxu0  ;;  %v2020_v35 = vpop.f32.mrf.mxu1 }
  0xd7   : > { %v392_v31 = vmax.f32 %v299_v29, 0.0 }
  0xd8   : > { %v303_v33 = vpop.f32.mrf.mxu0  ;;  %v2702_v38 = vpop.f32.mrf.mxu1 }
  0xd9   : > { %v304_v34 = vadd.f32 %v2693_v27, %v303_v33  ;;  %2054 = vmatmul.mubr.msk.f32.vlgmr.msra.gmra.mxu1 %vm420_vm2, %v392_v31 }
  0xda   : > { %v1993_v36 = vpop.f32.mrf.mxu0  ;;  %2056 = vmatprep.mubr.msk.f32.mxu1 %vm2486_vm0, %v2485_v1  ;;  %v2023_v41 = vpop.f32.mrf.mxu1 }
  0xdb   : > { %v393_v37 = vmax.f32 %v304_v34, 0.0 }
  0xdc   : > { %v308_v39 = vpop.f32.mrf.mxu0  ;;  %v2708_v44 = vpop.f32.mrf.mxu1 }
  0xdd   : > { %v309_v40 = vadd.f32 %v2693_v27, %v308_v39  ;;  %2057 = vmatmul.mubr.msk.f32.gmra.mxu1 %vm420_vm2, %v393_v37 }
  0xde   : > { %v1996_v42 = vpop.f32.mrf.mxu0  ;;  %2059 = vmatprep.mubr.msk.f32.mxu1 %vm2486_vm0, %v2485_v1  ;;  %v2026_v47 = vpop.f32.mrf.mxu1 }
  0xdf   : > { %v394_v43 = vmax.f32 %v309_v40, 0.0  ;;  %v349_v42 = vadd.f32 %v2693_v27, %v2696_v32  ;;  %v359_v32 = vadd.f32 %v2693_v27, %v2708_v44 }
  0xe0   : > { %v313_v45 = vpop.f32.mrf.mxu0  ;;  %v363_v50 = vpop.f32.mrf.mxu1 }
  0xe1   : > { %v314_v46 = vadd.f32 %v2693_v27, %v313_v45  ;;  %2060 = vmatmul.mubr.msk.f32.gmra.mxu1 %vm420_vm2, %v394_v43  ;;  %v402_v47 = vmax.f32 %v349_v42, 0.0 }
  0xe2   : > { %v1999_v48 = vpop.f32.mrf.mxu0  ;;  %2062 = vmatprep.mubr.msk.f32.mxu1 %vm2486_vm0, %v2485_v1  ;;  %v2029_v53 = vpop.f32.mrf.mxu1 }
  0xe3   : > { %v395_v49 = vmax.f32 %v314_v46, 0.0  ;;  %v354_v48 = vadd.f32 %v2693_v27, %v2702_v38 }
  0xe4   : > { %v318_v51 = vpop.f32.mrf.mxu0  ;;  %v368_v56 = vpop.f32.mrf.mxu1 }
  0xe5   : > { %v319_v52 = vadd.f32 %v2693_v27, %v318_v51  ;;  %2063 = vmatmul.mubr.msk.f32.gmra.mxu1 %vm420_vm2, %v395_v49  ;;  %v403_v49 = vmax.f32 %v354_v48, 0.0  ;;  %v404_v51 = vmax.f32 %v359_v32, 0.0  ;;  %v369_v53 = vadd.f32 %v2693_v27, %v368_v56 }
  0xe6   : > { %v2002_v54 = vpop.f32.mrf.mxu0  ;;  %2065 = vmatprep.mubr.msk.f32.mxu1 %vm2486_vm0, %v2485_v1  ;;  %v2032_v59 = vpop.f32.mrf.mxu1 }
  0xe7   : > { %v396_v55 = vmax.f32 %v319_v52, 0.0  ;;  %v364_v52 = vadd.f32 %v2693_v27, %v363_v50  ;;  %v406_v44 = vmax.f32 %v369_v53, 0.0 }
  0xe8   : > { %v323_v57 = vpop.f32.mrf.mxu0  ;;  %v373_v62 = vpop.f32.mrf.mxu1 }
  0xe9   : > { %v324_v58 = vadd.f32 %v2693_v27, %v323_v57  ;;  %2066 = vmatmul.mubr.msk.f32.gmra.mxu1 %vm420_vm2, %v396_v55  ;;  %v405_v38 = vmax.f32 %v364_v52, 0.0  ;;  %v374_v54 = vadd.f32 %v2693_v27, %v373_v62  ;;  %v1060_v62 = vld [vmem:[%s3165_s1 + $0x98] sm:$0xff] }
  0xea   : > { %v2005_v60 = vpop.f32.mrf.mxu0  ;;  %2068 = vmatprep.mubr.msk.f32.mxu1 %vm2486_vm0, %v2485_v1  ;;  %v2035_v2 = vpop.f32.mrf.mxu1  ;;  %2172 = vmatpush3.msra.mxu1 %v1060_v62 }
  0xeb   : > { %v397_v61 = vmax.f32 %v324_v58, 0.0  ;;  %v407_v50 = vmax.f32 %v374_v54, 0.0  ;;  %2173 = vmatprep.subr.mxu1 %v2485_v1  ;;  %v1057_v2 = vld [vmem:[%s3165_s1 + $0x80] sm:$0xff] }
  0xec   : > { %v328_v63 = vpop.f32.mrf.mxu0  ;;  %v378_v10 = vpop.f32.mrf.mxu1 }
  0xed   : > { %v329_v0 = vadd.f32 %v2693_v27, %v328_v63  ;;  %2069 = vmatmul.mubr.msk.f32.gmra.mxu1 %vm420_vm2, %v397_v61  ;;  %v379_v55 = vadd.f32 %v2693_v27, %v378_v10  ;;  %v810_v61 = vld [vmem:[%s3165_s1 + $0x50] sm:$0xff]  ;;  %v1054_v10 = vld [vmem:[%s3165_s1 + $0x68] sm:$0xff] }
  0xee   : > { %v2008_v3 = vpop.f32.mrf.mxu0  ;;  %2071 = vmatprep.mubr.msk.f32.mxu1 %vm2486_vm0, %v2485_v1  ;;  %v2038_v28 = vpop.f32.mrf.mxu1  ;;  %2111 = vmatpush3.msra.mxu0 %v810_v61  ;;  %v1059_v63 = vld [vmem:[%s3165_s1 + $0x90] sm:$0xff] }
  0xef   : > { %v398_v7 = vmax.f32 %v329_v0, 0.0  ;;  %v408_v56 = vmax.f32 %v379_v55, 0.0  ;;  %2112 = vmatprep.subr.mxu0 %v2485_v1  ;;  %v1058_v0 = vld [vmem:[%s3165_s1 + $0x88] sm:$0xff]  ;;  %2174 = vmatpush3.msra.mxu1 %v1059_v63  ;;  %v1056_v3 = vld [vmem:[%s3165_s1 + $0x78] sm:$0xff] }
  0xf0   : > { %v333_v13 = vpop.f32.mrf.mxu0  ;;  %v383_v31 = vpop.f32.mrf.mxu1  ;;  %2175 = vmatprep.subr.mxu1 %v2485_v1 }
  0xf1   : > { %v334_v16 = vadd.f32 %v2693_v27, %v333_v13  ;;  %2072 = vmatmul.mubr.msk.f32.gmra.mxu1 %vm420_vm2, %v398_v7  ;;  %v384_v57 = vadd.f32 %v2693_v27, %v383_v31  ;;  %v1055_v7 = vld [vmem:[%s3165_s1 + $0x70] sm:$0xff]  ;;  %v2817_v13 = vld [vmem:[%s3165_s1 + $0x40] ss:$0 sm:$0xff] }
  0xf2   : > { %v2011_v29 = vpop.f32.mrf.mxu0  ;;  %2074 = vmatprep.mubr.msk.f32.mxu1 %vm2486_vm0, %v2485_v1  ;;  %v2041_v35 = vpop.f32.mrf.mxu1  ;;  %2176 = vmatpush3.msra.mxu1 %v1058_v0 }
  0xf3   : > { %v399_v30 = vmax.f32 %v334_v16, 0.0  ;;  %v409_v58 = vmax.f32 %v384_v57, 0.0  ;;  %2177 = vmatprep.subr.mxu1 %v2485_v1  ;;  %v1053_v16 = vld [vmem:[%s3165_s1 + $0x60] sm:$0xff] }
  0xf4   : > { %v338_v33 = vpop.f32.mrf.mxu0  ;;  %v388_v39 = vpop.f32.mrf.mxu1  ;;  %2178 = vmatpush3.msra.mxu1 %v1057_v2 }
  0xf5   : > { %v339_v34 = vadd.f32 %v2693_v27, %v338_v33  ;;  %2075 = vmatmul.mubr.msk.f32.gmra.mxu1 %vm420_vm2, %v399_v30  ;;  %v389_v59 = vadd.f32 %v2693_v27, %v388_v39  ;;  %2179 = vmatprep.subr.mxu1 %v2485_v1 }
  0xf6   : > { %v2014_v36 = vpop.f32.mrf.mxu0  ;;  %2077 = vmatprep.mubr.msk.f32.mxu1 %vm2486_vm0, %v2485_v1  ;;  %v2044_v43 = vpop.f32.mrf.mxu1  ;;  %2180 = vmatpush3.msra.mxu1 %v1056_v3 }
  0xf7   : > { %v400_v37 = vmax.f32 %v339_v34, 0.0  ;;  %v410_v60 = vmax.f32 %v389_v59, 0.0  ;;  %2181 = vmatprep.subr.mxu1 %v2485_v1 }
  0xf8   : > { %v343_v40 = vpop.f32.mrf.mxu0  ;;  %2182 = vmatpush3.msra.mxu1 %v1055_v7 }
  0xf9   : > { %v344_v41 = vadd.f32 %v2693_v27, %v343_v40  ;;  %2078 = vmatmul.mubr.msk.f32.gmra.mxu1 %vm420_vm2, %v400_v37  ;;  %v809_v27 = vld [vmem:[%s3165_s1 + $0x48] sm:$0xff]  ;;  %2183 = vmatprep.subr.mxu1 %v2485_v1 }
  0xfa   : > { %v2017_v45 = vpop.f32.mrf.mxu0  ;;  %2080 = vmatprep.mubr.msk.f32.mxu1 %vm2486_vm0, %v2485_v1  ;;  %2113 = vmatpush3.msra.mxu0 %v809_v27 }
  0xfb   : > { %v401_v46 = vmax.f32 %v344_v41, 0.0  ;;  %2244 = vmatprep.subr.mxu0 %v2485_v1  ;;  %2184 = vmatpush3.msra.mxu1 %v1054_v10 }
  0xfc   : > { %2185 = vmatprep.subr.mxu1 %v2485_v1 }
  0xfd   : > { %2081 = vmatmul.mubr.msk.f32.gmra.mxu1 %vm420_vm2, %v401_v46 }
  0xfe   : > { %2083 = vmatprep.mubr.msk.f32.mxu1 %vm2486_vm0, %v2485_v1  ;;  %2186 = vmatpush3.msra.mxu1 %v1053_v16 }
 0x101   : > { %2084 = vmatmul.mubr.msk.f32.gmra.mxu1 %vm420_vm2, %v402_v47 }
 0x102   : > { %2086 = vmatprep.mubr.msk.f32.mxu1 %vm2486_vm0, %v2485_v1 }
 0x105   : > { %2087 = vmatmul.mubr.msk.f32.gmra.mxu1 %vm420_vm2, %v403_v49 }
 0x106   : > { %2089 = vmatprep.mubr.msk.f32.mxu1 %vm2486_vm0, %v2485_v1 }
 0x109   : > { %2090 = vmatmul.mubr.msk.f32.gmra.mxu1 %vm420_vm2, %v404_v51 }
 0x10a   : > { %2092 = vmatprep.mubr.msk.f32.mxu1 %vm2486_vm0, %v2485_v1 }
 0x10d   : > { %2093 = vmatmul.mubr.msk.f32.gmra.mxu1 %vm420_vm2, %v405_v38 }
 0x10e   : > { %2095 = vmatprep.mubr.msk.f32.mxu1 %vm2486_vm0, %v2485_v1 }
 0x111   : > { %2096 = vmatmul.mubr.msk.f32.gmra.mxu1 %vm420_vm2, %v406_v44 }
 0x112   : > { %2098 = vmatprep.mubr.msk.f32.mxu1 %vm2486_vm0, %v2485_v1 }
 0x115   : > { %2099 = vmatmul.mubr.msk.f32.gmra.mxu1 %vm420_vm2, %v407_v50 }
 0x116   : > { %2101 = vmatprep.mubr.msk.f32.mxu1 %vm2486_vm0, %v2485_v1 }
 0x119   : > { %2102 = vmatmul.mubr.msk.f32.gmra.mxu1 %vm420_vm2, %v408_v56 }
 0x11a   : > { %2104 = vmatprep.mubr.msk.f32.mxu1 %vm2486_vm0, %v2485_v1 }
 0x11d   : > { %2105 = vmatmul.mubr.msk.f32.gmra.mxu1 %vm420_vm2, %v409_v58 }
 0x11e   : > { %2107 = vmatprep.mubr.msk.f32.mxu1 %vm2486_vm0, %v2485_v1 }
 0x121   : > { %2108 = vmatmul.mubr.msk.f32.gmra.mxu1 %vm420_vm2, %v410_v60 }
 0x122   : > { %2187 = vmatprep.mubr.msk.f32.mxu1 %vm2486_vm0, %v2485_v1 }
 0x199   : > { %v544_v28 = vpop.f32.mrf.mxu1 }
 0x19a   : > { %v545_v29 = vadd.f32 %v2817_v13, %v544_v28 }
 0x19b   : > { %v2055_v30 = vpop.f32.mrf.mxu1 }
 0x19c   : > { %v1766_v31 = vmul.f32 -1.442695, %v545_v29 }
 0x19d   : > { %v549_v33 = vpop.f32.mrf.mxu1 }
 0x19e   : > { %2325 = vpow2.f32 %v1766_v31  ;;  %v550_v34 = vadd.f32 %v2817_v13, %v549_v33 }
 0x19f   : > { %v2058_v35 = vpop.f32.mrf.mxu1 }
 0x1a0   : > { %v1767_v36 = vmul.f32 -1.442695, %v550_v34 }
 0x1a1   : > { %v554_v37 = vpop.f32.mrf.mxu1 }
 0x1a2   : > { %2327 = vpow2.f32 %v1767_v36  ;;  %v555_v39 = vadd.f32 %v2817_v13, %v554_v37 }
 0x1a3   : > { %v2061_v40 = vpop.f32.mrf.mxu1 }
 0x1a4   : > { %v1768_v41 = vmul.f32 -1.442695, %v555_v39 }
 0x1a5   : > { %v559_v42 = vpop.f32.mrf.mxu1 }
 0x1a6   : > { %2329 = vpow2.f32 %v1768_v41  ;;  %v560_v43 = vadd.f32 %v2817_v13, %v559_v42 }
 0x1a7   : > { %v2064_v45 = vpop.f32.mrf.mxu1 }
 0x1a8   : > { %v1769_v46 = vmul.f32 -1.442695, %v560_v43 }
 0x1a9   : > { %v564_v47 = vpop.f32.mrf.mxu1 }
 0x1aa   : > { %2331 = vpow2.f32 %v1769_v46  ;;  %v565_v48 = vadd.f32 %v2817_v13, %v564_v47 }
 0x1ab   : > { %v2326_v49 = vpop.eup %2325  ;;  %v2067_v32 = vpop.f32.mrf.mxu1 }
 0x1ac   : > { %v695_v51 = vadd.f32 1.0, %v2326_v49  ;;  %v1770_v52 = vmul.f32 -1.442695, %v565_v48 }
 0x1ad   : > { %v569_v38 = vpop.f32.mrf.mxu1 }
 0x1ae   : > { %2333 = vrcp.f32 %v695_v51  ;;  %v570_v53 = vadd.f32 %v2817_v13, %v569_v38 }
 0x1af   : > { %v2328_v44 = vpop.eup %2327  ;;  %2335 = vpow2.f32 %v1770_v52  ;;  %v2070_v54 = vpop.f32.mrf.mxu1 }
 0x1b0   : > { %v696_v50 = vadd.f32 1.0, %v2328_v44  ;;  %v1771_v55 = vmul.f32 -1.442695, %v570_v53 }
 0x1b1   : > { %v574_v56 = vpop.f32.mrf.mxu1 }
 0x1b2   : > { %2337 = vrcp.f32 %v696_v50  ;;  %v575_v57 = vadd.f32 %v2817_v13, %v574_v56 }
 0x1b3   : > { %v2330_v58 = vpop.eup %2329  ;;  %2339 = vpow2.f32 %v1771_v55  ;;  %v2073_v59 = vpop.f32.mrf.mxu1 }
 0x1b4   : > { %v697_v60 = vadd.f32 1.0, %v2330_v58  ;;  %v1772_v61 = vmul.f32 -1.442695, %v575_v57 }
 0x1b5   : > { %v579_v27 = vpop.f32.mrf.mxu1 }
 0x1b6   : > { %2341 = vrcp.f32 %v697_v60  ;;  %v580_v62 = vadd.f32 %v2817_v13, %v579_v27 }
 0x1b7   : > { %v2332_v63 = vpop.eup %2331  ;;  %2343 = vpow2.f32 %v1772_v61  ;;  %v2076_v0 = vpop.f32.mrf.mxu1 }
 0x1b8   : > { %v698_v2 = vadd.f32 1.0, %v2332_v63  ;;  %v1773_v3 = vmul.f32 -1.442695, %v580_v62 }
 0x1b9   : > { %v584_v7 = vpop.f32.mrf.mxu1 }
 0x1ba   : > { %2345 = vrcp.f32 %v698_v2  ;;  %v585_v10 = vadd.f32 %v2817_v13, %v584_v7 }
 0x1bb   : > { %v2334_v16 = vpop.eup %2333  ;;  %2347 = vpow2.f32 %v1773_v3  ;;  %v2079_v28 = vpop.f32.mrf.mxu1 }
 0x1bc   : > { %v2336_v29 = vpop.eup %2335  ;;  %v752_v30 = vmax.f32 %v2334_v16, 0.0  ;;  %v1774_v31 = vmul.f32 -1.442695, %v585_v10 }
 0x1bd   : > { %v699_v33 = vadd.f32 1.0, %v2336_v29  ;;  %v589_v34 = vpop.f32.mrf.mxu1 }
 0x1be   : > { %v771_v35 = vmin.f32 %v752_v30, 1.0  ;;  %2349 = vpow2.f32 %v1774_v31  ;;  %v590_v36 = vadd.f32 %v2817_v13, %v589_v34 }
 0x1bf   : > { %v2338_v37 = vpop.eup %2337  ;;  %2351 = vrcp.f32 %v699_v33  ;;  %v2082_v39 = vpop.f32.mrf.mxu1 }
 0x1c0   : > { %v2340_v40 = vpop.eup %2339  ;;  %v790_v41 = vmul.f32 %v771_v35, %v2540_v4  ;;  %v753_v42 = vmax.f32 %v2338_v37, 0.0  ;;  %v1775_v43 = vmul.f32 -1.442695, %v590_v36 }
 0x1c1   : > { %v700_v45 = vadd.f32 1.0, %v2340_v40  ;;  %v594_v46 = vpop.f32.mrf.mxu1 }
 0x1c2   : > { %2353 = vpow2.f32 %v1775_v43  ;;  %v595_v47 = vadd.f32 %v2817_v13, %v594_v46  ;;  %2115 = vmatmul.mubr.msk.f32.vlgmr.msra.gmra.mxu0 %vm816_vm3, %v790_v41  ;;  %v772_v48 = vmin.f32 %v753_v42, 1.0 }
 0x1c3   : > { %v2342_v49 = vpop.eup %2341  ;;  %2355 = vrcp.f32 %v700_v45  ;;  %v2085_v32 = vpop.f32.mrf.mxu1  ;;  %2117 = vmatprep.mubr.msk.f32.mxu0 %vm2486_vm0, %v2485_v1 }
 0x1c4   : > { %v2344_v51 = vpop.eup %2343  ;;  %v754_v52 = vmax.f32 %v2342_v49, 0.0  ;;  %v1776_v38 = vmul.f32 -1.442695, %v595_v47  ;;  %v791_v4 = vmul.f32 %v772_v48, %v2549_v5 }
 0x1c5   : > { %v701_v53 = vadd.f32 1.0, %v2344_v51  ;;  %v599_v44 = vpop.f32.mrf.mxu1 }
 0x1c6   : > { %2357 = vpow2.f32 %v1776_v38  ;;  %v600_v54 = vadd.f32 %v2817_v13, %v599_v44  ;;  %2118 = vmatmul.mubr.msk.f32.gmra.mxu0 %vm816_vm3, %v791_v4  ;;  %v773_v50 = vmin.f32 %v754_v52, 1.0 }
 0x1c7   : > { %v2346_v55 = vpop.eup %2345  ;;  %2359 = vrcp.f32 %v701_v53  ;;  %v2088_v56 = vpop.f32.mrf.mxu1  ;;  %2120 = vmatprep.mubr.msk.f32.mxu0 %vm2486_vm0, %v2485_v1 }
 0x1c8   : > { %v2348_v57 = vpop.eup %2347  ;;  %v755_v58 = vmax.f32 %v2346_v55, 0.0  ;;  %v1777_v59 = vmul.f32 -1.442695, %v600_v54  ;;  %v792_v60 = vmul.f32 %v773_v50, %v2569_v9 }
 0x1c9   : > { %v702_v5 = vadd.f32 1.0, %v2348_v57  ;;  %v604_v61 = vpop.f32.mrf.mxu1 }
 0x1ca   : > { %2361 = vpow2.f32 %v1777_v59  ;;  %v605_v27 = vadd.f32 %v2817_v13, %v604_v61  ;;  %2121 = vmatmul.mubr.msk.f32.gmra.mxu0 %vm816_vm3, %v792_v60  ;;  %v774_v62 = vmin.f32 %v755_v58, 1.0 }
 0x1cb   : > { %v2350_v63 = vpop.eup %2349  ;;  %2363 = vrcp.f32 %v702_v5  ;;  %v2091_v0 = vpop.f32.mrf.mxu1  ;;  %2123 = vmatprep.mubr.msk.f32.mxu0 %vm2486_vm0, %v2485_v1 }
 0x1cc   : > { %v2352_v2 = vpop.eup %2351  ;;  %v703_v3 = vadd.f32 1.0, %v2350_v63  ;;  %v1778_v7 = vmul.f32 -1.442695, %v605_v27  ;;  %v793_v10 = vmul.f32 %v774_v62, %v2587_v12 }
 0x1cd   : > { %v756_v9 = vmax.f32 %v2352_v2, 0.0  ;;  %v609_v16 = vpop.f32.mrf.mxu1 }
 0x1ce   : > { %2365 = vrcp.f32 %v703_v3  ;;  %v610_v28 = vadd.f32 %v2817_v13, %v609_v16  ;;  %2124 = vmatmul.mubr.msk.f32.gmra.mxu0 %vm816_vm3, %v793_v10 }
 0x1cf   : > { %v2354_v29 = vpop.eup %2353  ;;  %2367 = vpow2.f32 %v1778_v7  ;;  %v2094_v30 = vpop.f32.mrf.mxu1  ;;  %2126 = vmatprep.mubr.msk.f32.mxu0 %vm2486_vm0, %v2485_v1  ;;  %v775_v31 = vmin.f32 %v756_v9, 1.0 }
 0x1d0   : > { %v2356_v33 = vpop.eup %2355  ;;  %v704_v34 = vadd.f32 1.0, %v2354_v29  ;;  %v1779_v35 = vmul.f32 -1.442695, %v610_v28 }
 0x1d1   : > { %v757_v36 = vmax.f32 %v2356_v33, 0.0  ;;  %v614_v37 = vpop.f32.mrf.mxu1  ;;  %v794_v12 = vmul.f32 %v775_v31, %v2605_v15 }
 0x1d2   : > { %2369 = vrcp.f32 %v704_v34  ;;  %v615_v39 = vadd.f32 %v2817_v13, %v614_v37 }
 0x1d3   : > { %v2358_v40 = vpop.eup %2357  ;;  %2371 = vpow2.f32 %v1779_v35  ;;  %2127 = vmatmul.mubr.msk.f32.gmra.mxu0 %vm816_vm3, %v794_v12  ;;  %v2097_v41 = vpop.f32.mrf.mxu1  ;;  %v776_v42 = vmin.f32 %v757_v36, 1.0 }
 0x1d4   : > { %v2360_v43 = vpop.eup %2359  ;;  %v705_v45 = vadd.f32 1.0, %v2358_v40  ;;  %v1780_v46 = vmul.f32 -1.442695, %v615_v39  ;;  %2129 = vmatprep.mubr.msk.f32.mxu0 %vm2486_vm0, %v2485_v1 }
 0x1d5   : > { %v758_v47 = vmax.f32 %v2360_v43, 0.0  ;;  %v619_v48 = vpop.f32.mrf.mxu1  ;;  %v795_v49 = vmul.f32 %v776_v42, %v2623_v18 }
 0x1d6   : > { %2373 = vrcp.f32 %v705_v45  ;;  %v620_v15 = vadd.f32 %v2817_v13, %v619_v48 }
 0x1d7   : > { %v2362_v32 = vpop.eup %2361  ;;  %2375 = vpow2.f32 %v1780_v46  ;;  %2130 = vmatmul.mubr.msk.f32.gmra.mxu0 %vm816_vm3, %v795_v49  ;;  %v2100_v51 = vpop.f32.mrf.mxu1  ;;  %v777_v52 = vmin.f32 %v758_v47, 1.0 }
 0x1d8   : > { %v2364_v38 = vpop.eup %2363  ;;  %v706_v4 = vadd.f32 1.0, %v2362_v32  ;;  %v1781_v53 = vmul.f32 -1.442695, %v620_v15  ;;  %2132 = vmatprep.mubr.msk.f32.mxu0 %vm2486_vm0, %v2485_v1 }
 0x1d9   : > { %v759_v44 = vmax.f32 %v2364_v38, 0.0  ;;  %v624_v54 = vpop.f32.mrf.mxu1  ;;  %v796_v50 = vmul.f32 %v777_v52, %v2638_v20 }
 0x1da   : > { %2377 = vrcp.f32 %v706_v4  ;;  %v625_v18 = vadd.f32 %v2817_v13, %v624_v54 }
 0x1db   : > { %v2366_v55 = vpop.eup %2365  ;;  %2379 = vpow2.f32 %v1781_v53  ;;  %2133 = vmatmul.mubr.msk.f32.gmra.mxu0 %vm816_vm3, %v796_v50  ;;  %v2103_v56 = vpop.f32.mrf.mxu1  ;;  %v778_v57 = vmin.f32 %v759_v44, 1.0 }
 0x1dc   : > { %v2368_v58 = vpop.eup %2367  ;;  %v760_v59 = vmax.f32 %v2366_v55, 0.0  ;;  %v1782_v60 = vmul.f32 -1.442695, %v625_v18  ;;  %2135 = vmatprep.mubr.msk.f32.mxu0 %vm2486_vm0, %v2485_v1 }
 0x1dd   : > { %v707_v5 = vadd.f32 1.0, %v2368_v58  ;;  %v629_v61 = vpop.f32.mrf.mxu1  ;;  %v797_v27 = vmul.f32 %v778_v57, %v2652_v22 }
 0x1de   : > { %2381 = vpow2.f32 %v1782_v60  ;;  %v630_v20 = vadd.f32 %v2817_v13, %v629_v61  ;;  %v779_v62 = vmin.f32 %v760_v59, 1.0 }
 0x1df   : > { %v2370_v63 = vpop.eup %2369  ;;  %2383 = vrcp.f32 %v707_v5  ;;  %2136 = vmatmul.mubr.msk.f32.gmra.mxu0 %vm816_vm3, %v797_v27  ;;  %v2106_v0 = vpop.f32.mrf.mxu1 }
 0x1e0   : > { %v2372_v2 = vpop.eup %2371  ;;  %v761_v3 = vmax.f32 %v2370_v63, 0.0  ;;  %v1783_v7 = vmul.f32 -1.442695, %v630_v20  ;;  %2138 = vmatprep.mubr.msk.f32.mxu0 %vm2486_vm0, %v2485_v1  ;;  %v798_v10 = vmul.f32 %v779_v62, %v2666_v24  ;;  %v1303_v62 = vld [vmem:[%s3165_s1 + $0xa8] sm:$0xff]  ;;  %v2937_v63 = vld [vmem:[%s3165_s1 + $0x58] ss:$0 sm:$0xff] }
 0x1e1   : > { %v708_v9 = vadd.f32 1.0, %v2372_v2  ;;  %v634_v16 = vpop.f32.mrf.mxu1 }
 0x1e2   : > { %2385 = vpow2.f32 %v1783_v7  ;;  %v635_v22 = vadd.f32 %v2817_v13, %v634_v16  ;;  %v780_v28 = vmin.f32 %v761_v3, 1.0 }
 0x1e3   : > { %v2374_v29 = vpop.eup %2373  ;;  %2387 = vrcp.f32 %v708_v9  ;;  %2139 = vmatmul.mubr.msk.f32.gmra.mxu0 %vm816_vm3, %v798_v10  ;;  %v2109_v30 = vpop.f32.mrf.mxu1 }
 0x1e4   : > { %v2376_v31 = vpop.eup %2375  ;;  %v762_v33 = vmax.f32 %v2374_v29, 0.0  ;;  %v1784_v34 = vmul.f32 -1.442695, %v635_v22  ;;  %2141 = vmatprep.mubr.msk.f32.mxu0 %vm2486_vm0, %v2485_v1  ;;  %v799_v35 = vmul.f32 %v780_v28, %v2680_v26 }
 0x1e5   : > { %v709_v24 = vadd.f32 1.0, %v2376_v31 }
 0x1e6   : > { %2389 = vpow2.f32 %v1784_v34  ;;  %v781_v36 = vmin.f32 %v762_v33, 1.0 }
 0x1e7   : > { %v2378_v37 = vpop.eup %2377  ;;  %2391 = vrcp.f32 %v709_v24  ;;  %2142 = vmatmul.mubr.msk.f32.gmra.mxu0 %vm816_vm3, %v799_v35 }
 0x1e8   : > { %v2380_v13 = vpop.eup %2379  ;;  %v763_v12 = vmax.f32 %v2378_v37, 0.0  ;;  %2144 = vmatprep.mubr.msk.f32.mxu0 %vm2486_vm0, %v2485_v1  ;;  %v800_v39 = vmul.f32 %v781_v36, %v2552_v6 }
 0x1e9   : > { %v710_v40 = vadd.f32 1.0, %v2380_v13 }
 0x1ea   : > { %v782_v41 = vmin.f32 %v763_v12, 1.0 }
 0x1eb   : > { %v2382_v42 = vpop.eup %2381  ;;  %2393 = vrcp.f32 %v710_v40  ;;  %2145 = vmatmul.mubr.msk.f32.gmra.mxu0 %vm816_vm3, %v800_v39 }
 0x1ec   : > { %v2384_v26 = vpop.eup %2383  ;;  %v711_v43 = vadd.f32 1.0, %v2382_v42  ;;  %2147 = vmatprep.mubr.msk.f32.mxu0 %vm2486_vm0, %v2485_v1  ;;  %v801_v45 = vmul.f32 %v782_v41, %v2564_v8 }
 0x1ed   : > { %v764_v46 = vmax.f32 %v2384_v26, 0.0 }
 0x1ee   : > { %2395 = vrcp.f32 %v711_v43 }
 0x1ef   : > { %v2386_v47 = vpop.eup %2385  ;;  %2148 = vmatmul.mubr.msk.f32.gmra.mxu0 %vm816_vm3, %v801_v45  ;;  %v783_v48 = vmin.f32 %v764_v46, 1.0 }
 0x1f0   : > { %v2388_v6 = vpop.eup %2387  ;;  %v712_v49 = vadd.f32 1.0, %v2386_v47  ;;  %2150 = vmatprep.mubr.msk.f32.mxu0 %vm2486_vm0, %v2485_v1 }
 0x1f1   : > { %v765_v15 = vmax.f32 %v2388_v6, 0.0  ;;  %v802_v32 = vmul.f32 %v783_v48, %v2582_v11 }
 0x1f2   : > { %2397 = vrcp.f32 %v712_v49 }
 0x1f3   : > { %v2390_v51 = vpop.eup %2389  ;;  %2151 = vmatmul.mubr.msk.f32.gmra.mxu0 %vm816_vm3, %v802_v32  ;;  %v784_v52 = vmin.f32 %v765_v15, 1.0 }
 0x1f4   : > { %v2392_v8 = vpop.eup %2391  ;;  %v713_v38 = vadd.f32 1.0, %v2390_v51  ;;  %2153 = vmatprep.mubr.msk.f32.mxu0 %vm2486_vm0, %v2485_v1 }
 0x1f5   : > { %v766_v4 = vmax.f32 %v2392_v8, 0.0  ;;  %v803_v53 = vmul.f32 %v784_v52, %v2600_v14 }
 0x1f6   : > { %2399 = vrcp.f32 %v713_v38 }
 0x1f7   : > { %2154 = vmatmul.mubr.msk.f32.gmra.mxu0 %vm816_vm3, %v803_v53  ;;  %v785_v44 = vmin.f32 %v766_v4, 1.0 }
 0x1f8   : > { %v2394_v54 = vpop.eup %2393  ;;  %2156 = vmatprep.mubr.msk.f32.mxu0 %vm2486_vm0, %v2485_v1 }
 0x1f9   : > { %v767_v11 = vmax.f32 %v2394_v54, 0.0  ;;  %v804_v50 = vmul.f32 %v785_v44, %v2618_v17 }
 0x1fb   : > { %v2396_v18 = vpop.eup %2395  ;;  %2157 = vmatmul.mubr.msk.f32.gmra.mxu0 %vm816_vm3, %v804_v50  ;;  %v786_v55 = vmin.f32 %v767_v11, 1.0 }
 0x1fc   : > { %v768_v56 = vmax.f32 %v2396_v18, 0.0  ;;  %2159 = vmatprep.mubr.msk.f32.mxu0 %vm2486_vm0, %v2485_v1 }
 0x1fd   : > { %v805_v14 = vmul.f32 %v786_v55, %v2633_v19 }
 0x1fe   : > { %v787_v57 = vmin.f32 %v768_v56, 1.0 }
 0x1ff   : > { %v2398_v58 = vpop.eup %2397  ;;  %2160 = vmatmul.mubr.msk.f32.gmra.mxu0 %vm816_vm3, %v805_v14 }
 0x200   : > { %v769_v59 = vmax.f32 %v2398_v58, 0.0  ;;  %2162 = vmatprep.mubr.msk.f32.mxu0 %vm2486_vm0, %v2485_v1  ;;  %v806_v17 = vmul.f32 %v787_v57, %v2647_v21  ;;  %v1306_v21 = vld [vmem:[%s3165_s1 + $0xc0] sm:$0xff] }
 0x201   : > { %2245 = vmatpush3.msra.mxu0 %v1306_v21 }
 0x202   : > { %v788_v60 = vmin.f32 %v769_v59, 1.0  ;;  %2246 = vmatprep.subr.mxu0 %v2485_v1 }
 0x203   : > { %v2400_v5 = vpop.eup %2399  ;;  %2163 = vmatmul.mubr.msk.f32.gmra.mxu0 %vm816_vm3, %v806_v17 }
 0x204   : > { %v770_v61 = vmax.f32 %v2400_v5, 0.0  ;;  %2165 = vmatprep.mubr.msk.f32.mxu0 %vm2486_vm0, %v2485_v1  ;;  %v807_v19 = vmul.f32 %v788_v60, %v2661_v23  ;;  %v1305_v23 = vld [vmem:[%s3165_s1 + $0xb8] sm:$0xff] }
 0x205   : > { %2247 = vmatpush3.msra.mxu0 %v1305_v23 }
 0x206   : > { %v789_v27 = vmin.f32 %v770_v61, 1.0  ;;  %2248 = vmatprep.subr.mxu0 %v2485_v1 }
 0x207   : > { %2166 = vmatmul.mubr.msk.f32.gmra.mxu0 %vm816_vm3, %v807_v19 }
 0x208   : > { %2168 = vmatprep.mubr.msk.f32.mxu0 %vm2486_vm0, %v2485_v1  ;;  %v808_v20 = vmul.f32 %v789_v27, %v2675_v25  ;;  %v1304_v25 = vld [vmem:[%s3165_s1 + $0xb0] sm:$0xff] }
 0x209   : > { %2249 = vmatpush3.msra.mxu0 %v1304_v25 }
 0x20a   : > { %2250 = vmatprep.subr.mxu0 %v2485_v1 }
 0x20b   : > { %2169 = vmatmul.mubr.msk.f32.gmra.mxu0 %vm816_vm3, %v808_v20 }
 0x20c   : > { %2252 = vmatprep.mubr.msk.f32.mxu0 %vm2486_vm0, %v2485_v1  ;;  %2251 = vmatpush3.msra.mxu0 %v1303_v62 }
 0x282   : > { %v940_v0 = vpop.f32.mrf.mxu0 }
 0x283   : > { %v941_v2 = vadd.f32 %v2937_v63, %v940_v0 }
 0x284   : > { %v2116_v3 = vpop.f32.mrf.mxu0 }
 0x285   : > { %v1034_v7 = vmax.f32 %v941_v2, 0.0 }
 0x286   : > { %v945_v10 = vpop.f32.mrf.mxu0 }
 0x287   : > { %v946_v9 = vadd.f32 %v2937_v63, %v945_v10  ;;  %2188 = vmatmul.mubr.msk.f32.vlgmr.msra.gmra.mxu1 %vm1066_vm4, %v1034_v7 }
 0x288   : > { %v2119_v16 = vpop.f32.mrf.mxu0  ;;  %2190 = vmatprep.mubr.msk.f32.mxu1 %vm2486_vm0, %v2485_v1 }
 0x289   : > { %v1035_v22 = vmax.f32 %v946_v9, 0.0 }
 0x28a   : > { %v950_v28 = vpop.f32.mrf.mxu0 }
 0x28b   : > { %v951_v29 = vadd.f32 %v2937_v63, %v950_v28  ;;  %2191 = vmatmul.mubr.msk.f32.gmra.mxu1 %vm1066_vm4, %v1035_v22 }
 0x28c   : > { %v2122_v30 = vpop.f32.mrf.mxu0  ;;  %2193 = vmatprep.mubr.msk.f32.mxu1 %vm2486_vm0, %v2485_v1 }
 0x28d   : > { %v1036_v31 = vmax.f32 %v951_v29, 0.0 }
 0x28e   : > { %v955_v33 = vpop.f32.mrf.mxu0 }
 0x28f   : > { %v956_v34 = vadd.f32 %v2937_v63, %v955_v33  ;;  %2194 = vmatmul.mubr.msk.f32.gmra.mxu1 %vm1066_vm4, %v1036_v31 }
 0x290   : > { %v2125_v35 = vpop.f32.mrf.mxu0  ;;  %2196 = vmatprep.mubr.msk.f32.mxu1 %vm2486_vm0, %v2485_v1 }
 0x291   : > { %v1037_v24 = vmax.f32 %v956_v34, 0.0  ;;  %v3016_v35 = vld [vmem:[%s3165_s1 + $0xa0] ss:$0 sm:$0xff] }
 0x293   : > { %v960_v36 = vpop.f32.mrf.mxu0  ;;  %2197 = vmatmul.mubr.msk.f32.gmra.mxu1 %vm1066_vm4, %v1037_v24 }
 0x294   : > { %v961_v37 = vadd.f32 %v2937_v63, %v960_v36  ;;  %2199 = vmatprep.mubr.msk.f32.mxu1 %vm2486_vm0, %v2485_v1 }
 0x295   : > { %v2128_v13 = vpop.f32.mrf.mxu0 }
 0x296   : > { %v1038_v12 = vmax.f32 %v961_v37, 0.0 }
 0x297   : > { %v965_v39 = vpop.f32.mrf.mxu0 }
 0x298   : > { %v966_v40 = vadd.f32 %v2937_v63, %v965_v39  ;;  %2200 = vmatmul.mubr.msk.f32.gmra.mxu1 %vm1066_vm4, %v1038_v12 }
 0x299   : > { %v2131_v41 = vpop.f32.mrf.mxu0  ;;  %2202 = vmatprep.mubr.msk.f32.mxu1 %vm2486_vm0, %v2485_v1 }
 0x29a   : > { %v1039_v42 = vmax.f32 %v966_v40, 0.0 }
 0x29b   : > { %v970_v26 = vpop.f32.mrf.mxu0 }
 0x29c   : > { %v971_v43 = vadd.f32 %v2937_v63, %v970_v26  ;;  %2203 = vmatmul.mubr.msk.f32.gmra.mxu1 %vm1066_vm4, %v1039_v42 }
 0x29d   : > { %v2134_v45 = vpop.f32.mrf.mxu0  ;;  %2205 = vmatprep.mubr.msk.f32.mxu1 %vm2486_vm0, %v2485_v1 }
 0x29e   : > { %v1040_v46 = vmax.f32 %v971_v43, 0.0 }
 0x29f   : > { %v975_v47 = vpop.f32.mrf.mxu0 }
 0x2a0   : > { %v976_v48 = vadd.f32 %v2937_v63, %v975_v47  ;;  %2206 = vmatmul.mubr.msk.f32.gmra.mxu1 %vm1066_vm4, %v1040_v46 }
 0x2a1   : > { %v2137_v6 = vpop.f32.mrf.mxu0  ;;  %2208 = vmatprep.mubr.msk.f32.mxu1 %vm2486_vm0, %v2485_v1 }
 0x2a2   : > { %v1041_v49 = vmax.f32 %v976_v48, 0.0 }
 0x2a3   : > { %v980_v15 = vpop.f32.mrf.mxu0 }
 0x2a4   : > { %v981_v32 = vadd.f32 %v2937_v63, %v980_v15  ;;  %2209 = vmatmul.mubr.msk.f32.gmra.mxu1 %vm1066_vm4, %v1041_v49 }
 0x2a5   : > { %v2140_v51 = vpop.f32.mrf.mxu0  ;;  %2211 = vmatprep.mubr.msk.f32.mxu1 %vm2486_vm0, %v2485_v1 }
 0x2a6   : > { %v1042_v52 = vmax.f32 %v981_v32, 0.0 }
 0x2a7   : > { %v985_v8 = vpop.f32.mrf.mxu0 }
 0x2a8   : > { %v986_v38 = vadd.f32 %v2937_v63, %v985_v8  ;;  %2212 = vmatmul.mubr.msk.f32.gmra.mxu1 %vm1066_vm4, %v1042_v52 }
 0x2a9   : > { %v2143_v4 = vpop.f32.mrf.mxu0  ;;  %2214 = vmatprep.mubr.msk.f32.mxu1 %vm2486_vm0, %v2485_v1 }
 0x2aa   : > { %v1043_v53 = vmax.f32 %v986_v38, 0.0 }
 0x2ab   : > { %v990_v44 = vpop.f32.mrf.mxu0 }
 0x2ac   : > { %v991_v54 = vadd.f32 %v2937_v63, %v990_v44  ;;  %2215 = vmatmul.mubr.msk.f32.gmra.mxu1 %vm1066_vm4, %v1043_v53 }
 0x2ad   : > { %v2146_v11 = vpop.f32.mrf.mxu0  ;;  %2217 = vmatprep.mubr.msk.f32.mxu1 %vm2486_vm0, %v2485_v1 }
 0x2ae   : > { %v1044_v50 = vmax.f32 %v991_v54, 0.0 }
 0x2af   : > { %v995_v18 = vpop.f32.mrf.mxu0 }
 0x2b0   : > { %v996_v55 = vadd.f32 %v2937_v63, %v995_v18  ;;  %2218 = vmatmul.mubr.msk.f32.gmra.mxu1 %vm1066_vm4, %v1044_v50 }
 0x2b1   : > { %v2149_v56 = vpop.f32.mrf.mxu0  ;;  %2220 = vmatprep.mubr.msk.f32.mxu1 %vm2486_vm0, %v2485_v1 }
 0x2b2   : > { %v1045_v14 = vmax.f32 %v996_v55, 0.0 }
 0x2b3   : > { %v1000_v57 = vpop.f32.mrf.mxu0 }
 0x2b4   : > { %v1001_v58 = vadd.f32 %v2937_v63, %v1000_v57  ;;  %2221 = vmatmul.mubr.msk.f32.gmra.mxu1 %vm1066_vm4, %v1045_v14 }
 0x2b5   : > { %v2152_v59 = vpop.f32.mrf.mxu0  ;;  %2223 = vmatprep.mubr.msk.f32.mxu1 %vm2486_vm0, %v2485_v1 }
 0x2b6   : > { %v1046_v17 = vmax.f32 %v1001_v58, 0.0 }
 0x2b7   : > { %v1005_v60 = vpop.f32.mrf.mxu0 }
 0x2b8   : > { %v1006_v5 = vadd.f32 %v2937_v63, %v1005_v60  ;;  %2224 = vmatmul.mubr.msk.f32.gmra.mxu1 %vm1066_vm4, %v1046_v17 }
 0x2b9   : > { %v2155_v61 = vpop.f32.mrf.mxu0  ;;  %2226 = vmatprep.mubr.msk.f32.mxu1 %vm2486_vm0, %v2485_v1 }
 0x2ba   : > { %v1047_v19 = vmax.f32 %v1006_v5, 0.0 }
 0x2bb   : > { %v1010_v27 = vpop.f32.mrf.mxu0 }
 0x2bc   : > { %v1011_v20 = vadd.f32 %v2937_v63, %v1010_v27  ;;  %2227 = vmatmul.mubr.msk.f32.gmra.mxu1 %vm1066_vm4, %v1047_v19 }
 0x2bd   : > { %v2158_v21 = vpop.f32.mrf.mxu0  ;;  %2229 = vmatprep.mubr.msk.f32.mxu1 %vm2486_vm0, %v2485_v1 }
 0x2be   : > { %v1048_v23 = vmax.f32 %v1011_v20, 0.0 }
 0x2bf   : > { %v1015_v25 = vpop.f32.mrf.mxu0 }
 0x2c0   : > { %v1016_v62 = vadd.f32 %v2937_v63, %v1015_v25  ;;  %2230 = vmatmul.mubr.msk.f32.gmra.mxu1 %vm1066_vm4, %v1048_v23 }
 0x2c1   : > { %v2161_v0 = vpop.f32.mrf.mxu0  ;;  %2232 = vmatprep.mubr.msk.f32.mxu1 %vm2486_vm0, %v2485_v1 }
 0x2c2   : > { %v1049_v2 = vmax.f32 %v1016_v62, 0.0 }
 0x2c3   : > { %v1020_v3 = vpop.f32.mrf.mxu0 }
 0x2c4   : > { %v1021_v7 = vadd.f32 %v2937_v63, %v1020_v3  ;;  %2233 = vmatmul.mubr.msk.f32.gmra.mxu1 %vm1066_vm4, %v1049_v2 }
 0x2c5   : > { %v2164_v10 = vpop.f32.mrf.mxu0  ;;  %2235 = vmatprep.mubr.msk.f32.mxu1 %vm2486_vm0, %v2485_v1 }
 0x2c6   : > { %v1050_v9 = vmax.f32 %v1021_v7, 0.0 }
 0x2c7   : > { %v1025_v16 = vpop.f32.mrf.mxu0 }
 0x2c8   : > { %v1026_v22 = vadd.f32 %v2937_v63, %v1025_v16  ;;  %2236 = vmatmul.mubr.msk.f32.gmra.mxu1 %vm1066_vm4, %v1050_v9 }
 0x2c9   : > { %v2167_v28 = vpop.f32.mrf.mxu0  ;;  %2238 = vmatprep.mubr.msk.f32.mxu1 %vm2486_vm0, %v2485_v1 }
 0x2ca   : > { %v1051_v29 = vmax.f32 %v1026_v22, 0.0 }
 0x2cb   : > { %v1030_v30 = vpop.f32.mrf.mxu0 }
 0x2cc   : > { %v1031_v31 = vadd.f32 %v2937_v63, %v1030_v30  ;;  %2239 = vmatmul.mubr.msk.f32.gmra.mxu1 %vm1066_vm4, %v1051_v29 }
 0x2cd   : > { %v2170_v33 = vpop.f32.mrf.mxu0  ;;  %2241 = vmatprep.mubr.msk.f32.mxu1 %vm2486_vm0, %v2485_v1 }
 0x2ce   : > { %v1052_v34 = vmax.f32 %v1031_v31, 0.0 }
 0x2d0   : > { %2242 = vmatmul.mubr.msk.f32.gmra.mxu1 %vm1066_vm4, %v1052_v34 }
 0x347   : > { %v1190_v24 = vpop.f32.mrf.mxu1 }
 0x348   : > { %v1191_v36 = vadd.f32 %v3016_v35, %v1190_v24 }
 0x349   : > { %v2189_v37 = vpop.f32.mrf.mxu1 }
 0x34a   : > { %v1284_v13 = vmax.f32 %v1191_v36, 0.0 }
 0x34b   : > { %v1195_v63 = vpop.f32.mrf.mxu1 }
 0x34c   : > { %v1196_v12 = vadd.f32 %v3016_v35, %v1195_v63  ;;  %2253 = vmatmul.mubr.msk.f32.vlgmr.msra.gmra.mxu0 %vm420_vm2, %v1284_v13 }
 0x34d   : > { %v2192_v39 = vpop.f32.mrf.mxu1  ;;  %2255 = vmatprep.mubr.msk.f32.mxu0 %vm2486_vm0, %v2485_v1 }
 0x34e   : > { %v1285_v40 = vmax.f32 %v1196_v12, 0.0 }
 0x34f   : > { %v1200_v41 = vpop.f32.mrf.mxu1 }
 0x350   : > { %v1201_v42 = vadd.f32 %v3016_v35, %v1200_v41  ;;  %2256 = vmatmul.mubr.msk.f32.gmra.mxu0 %vm420_vm2, %v1285_v40 }
 0x351   : > { %v2195_v26 = vpop.f32.mrf.mxu1  ;;  %2258 = vmatprep.mubr.msk.f32.mxu0 %vm2486_vm0, %v2485_v1 }
 0x352   : > { %v1286_v43 = vmax.f32 %v1201_v42, 0.0 }
 0x353   : > { %v1205_v45 = vpop.f32.mrf.mxu1 }
 0x354   : > { %v1206_v46 = vadd.f32 %v3016_v35, %v1205_v45  ;;  %2259 = vmatmul.mubr.msk.f32.gmra.mxu0 %vm420_vm2, %v1286_v43 }
 0x355   : > { %v2198_v47 = vpop.f32.mrf.mxu1  ;;  %2261 = vmatprep.mubr.msk.f32.mxu0 %vm2486_vm0, %v2485_v1 }
 0x356   : > { %v1287_v48 = vmax.f32 %v1206_v46, 0.0  ;;  %v3095_v47 = vld [vmem:[%s3165_s1 + $0xc8] ss:$0 sm:$0xff] }
 0x358   : > { %v1210_v6 = vpop.f32.mrf.mxu1  ;;  %2262 = vmatmul.mubr.msk.f32.gmra.mxu0 %vm420_vm2, %v1287_v48 }
 0x359   : > { %v1211_v49 = vadd.f32 %v3016_v35, %v1210_v6  ;;  %2264 = vmatprep.mubr.msk.f32.mxu0 %vm2486_vm0, %v2485_v1 }
 0x35a   : > { %v2201_v15 = vpop.f32.mrf.mxu1 }
 0x35b   : > { %v1288_v32 = vmax.f32 %v1211_v49, 0.0 }
 0x35c   : > { %v1215_v51 = vpop.f32.mrf.mxu1 }
 0x35d   : > { %v1216_v52 = vadd.f32 %v3016_v35, %v1215_v51  ;;  %2265 = vmatmul.mubr.msk.f32.gmra.mxu0 %vm420_vm2, %v1288_v32 }
 0x35e   : > { %v2204_v8 = vpop.f32.mrf.mxu1  ;;  %2267 = vmatprep.mubr.msk.f32.mxu0 %vm2486_vm0, %v2485_v1 }
 0x35f   : > { %v1289_v38 = vmax.f32 %v1216_v52, 0.0 }
 0x360   : > { %v1220_v4 = vpop.f32.mrf.mxu1 }
 0x361   : > { %v1221_v53 = vadd.f32 %v3016_v35, %v1220_v4  ;;  %2268 = vmatmul.mubr.msk.f32.gmra.mxu0 %vm420_vm2, %v1289_v38 }
 0x362   : > { %v2207_v44 = vpop.f32.mrf.mxu1  ;;  %2270 = vmatprep.mubr.msk.f32.mxu0 %vm2486_vm0, %v2485_v1 }
 0x363   : > { %v1290_v54 = vmax.f32 %v1221_v53, 0.0 }
 0x364   : > { %v1225_v11 = vpop.f32.mrf.mxu1 }
 0x365   : > { %v1226_v50 = vadd.f32 %v3016_v35, %v1225_v11  ;;  %2271 = vmatmul.mubr.msk.f32.gmra.mxu0 %vm420_vm2, %v1290_v54 }
 0x366   : > { %v2210_v18 = vpop.f32.mrf.mxu1  ;;  %2273 = vmatprep.mubr.msk.f32.mxu0 %vm2486_vm0, %v2485_v1 }
 0x367   : > { %v1291_v55 = vmax.f32 %v1226_v50, 0.0 }
 0x368   : > { %v1230_v56 = vpop.f32.mrf.mxu1 }
 0x369   : > { %v1231_v14 = vadd.f32 %v3016_v35, %v1230_v56  ;;  %2274 = vmatmul.mubr.msk.f32.gmra.mxu0 %vm420_vm2, %v1291_v55 }
 0x36a   : > { %v2213_v57 = vpop.f32.mrf.mxu1  ;;  %2276 = vmatprep.mubr.msk.f32.mxu0 %vm2486_vm0, %v2485_v1 }
 0x36b   : > { %v1292_v58 = vmax.f32 %v1231_v14, 0.0 }
 0x36c   : > { %v1235_v59 = vpop.f32.mrf.mxu1 }
 0x36d   : > { %v1236_v17 = vadd.f32 %v3016_v35, %v1235_v59  ;;  %2277 = vmatmul.mubr.msk.f32.gmra.mxu0 %vm420_vm2, %v1292_v58 }
 0x36e   : > { %v2216_v60 = vpop.f32.mrf.mxu1  ;;  %2279 = vmatprep.mubr.msk.f32.mxu0 %vm2486_vm0, %v2485_v1 }
 0x36f   : > { %v1293_v5 = vmax.f32 %v1236_v17, 0.0 }
 0x370   : > { %v1240_v61 = vpop.f32.mrf.mxu1 }
 0x371   : > { %v1241_v19 = vadd.f32 %v3016_v35, %v1240_v61  ;;  %2280 = vmatmul.mubr.msk.f32.gmra.mxu0 %vm420_vm2, %v1293_v5 }
 0x372   : > { %v2219_v27 = vpop.f32.mrf.mxu1  ;;  %2282 = vmatprep.mubr.msk.f32.mxu0 %vm2486_vm0, %v2485_v1 }
 0x373   : > { %v1294_v20 = vmax.f32 %v1241_v19, 0.0 }
 0x374   : > { %v1245_v21 = vpop.f32.mrf.mxu1 }
 0x375   : > { %v1246_v23 = vadd.f32 %v3016_v35, %v1245_v21  ;;  %2283 = vmatmul.mubr.msk.f32.gmra.mxu0 %vm420_vm2, %v1294_v20 }
 0x376   : > { %v2222_v25 = vpop.f32.mrf.mxu1  ;;  %2285 = vmatprep.mubr.msk.f32.mxu0 %vm2486_vm0, %v2485_v1 }
 0x377   : > { %v1295_v62 = vmax.f32 %v1246_v23, 0.0 }
 0x378   : > { %v1250_v0 = vpop.f32.mrf.mxu1 }
 0x379   : > { %v1251_v2 = vadd.f32 %v3016_v35, %v1250_v0  ;;  %2286 = vmatmul.mubr.msk.f32.gmra.mxu0 %vm420_vm2, %v1295_v62 }
 0x37a   : > { %v2225_v3 = vpop.f32.mrf.mxu1  ;;  %2288 = vmatprep.mubr.msk.f32.mxu0 %vm2486_vm0, %v2485_v1 }
 0x37b   : > { %v1296_v7 = vmax.f32 %v1251_v2, 0.0 }
 0x37c   : > { %v1255_v10 = vpop.f32.mrf.mxu1 }
 0x37d   : > { %v1256_v9 = vadd.f32 %v3016_v35, %v1255_v10  ;;  %2289 = vmatmul.mubr.msk.f32.gmra.mxu0 %vm420_vm2, %v1296_v7 }
 0x37e   : > { %v2228_v16 = vpop.f32.mrf.mxu1  ;;  %2291 = vmatprep.mubr.msk.f32.mxu0 %vm2486_vm0, %v2485_v1 }
 0x37f   : > { %v1297_v22 = vmax.f32 %v1256_v9, 0.0 }
 0x380   : > { %v1260_v28 = vpop.f32.mrf.mxu1 }
 0x381   : > { %v1261_v29 = vadd.f32 %v3016_v35, %v1260_v28  ;;  %2292 = vmatmul.mubr.msk.f32.gmra.mxu0 %vm420_vm2, %v1297_v22 }
 0x382   : > { %v2231_v30 = vpop.f32.mrf.mxu1  ;;  %2294 = vmatprep.mubr.msk.f32.mxu0 %vm2486_vm0, %v2485_v1 }
 0x383   : > { %v1298_v31 = vmax.f32 %v1261_v29, 0.0 }
 0x384   : > { %v1265_v33 = vpop.f32.mrf.mxu1 }
 0x385   : > { %v1266_v34 = vadd.f32 %v3016_v35, %v1265_v33  ;;  %2295 = vmatmul.mubr.msk.f32.gmra.mxu0 %vm420_vm2, %v1298_v31 }
 0x386   : > { %v2234_v24 = vpop.f32.mrf.mxu1  ;;  %2297 = vmatprep.mubr.msk.f32.mxu0 %vm2486_vm0, %v2485_v1 }
 0x387   : > { %v1299_v36 = vmax.f32 %v1266_v34, 0.0 }
 0x388   : > { %v1270_v37 = vpop.f32.mrf.mxu1 }
 0x389   : > { %v1271_v13 = vadd.f32 %v3016_v35, %v1270_v37  ;;  %2298 = vmatmul.mubr.msk.f32.gmra.mxu0 %vm420_vm2, %v1299_v36 }
 0x38a   : > { %v2237_v63 = vpop.f32.mrf.mxu1  ;;  %2300 = vmatprep.mubr.msk.f32.mxu0 %vm2486_vm0, %v2485_v1 }
 0x38b   : > { %v1300_v12 = vmax.f32 %v1271_v13, 0.0 }
 0x38c   : > { %v1275_v39 = vpop.f32.mrf.mxu1 }
 0x38d   : > { %v1276_v40 = vadd.f32 %v3016_v35, %v1275_v39  ;;  %2301 = vmatmul.mubr.msk.f32.gmra.mxu0 %vm420_vm2, %v1300_v12 }
 0x38e   : > { %v2240_v41 = vpop.f32.mrf.mxu1  ;;  %2303 = vmatprep.mubr.msk.f32.mxu0 %vm2486_vm0, %v2485_v1 }
 0x38f   : > { %v1301_v42 = vmax.f32 %v1276_v40, 0.0 }
 0x390   : > { %v1280_v26 = vpop.f32.mrf.mxu1 }
 0x391   : > { %v1281_v43 = vadd.f32 %v3016_v35, %v1280_v26  ;;  %2304 = vmatmul.mubr.msk.f32.gmra.mxu0 %vm420_vm2, %v1301_v42 }
 0x392   : > { %v2243_v45 = vpop.f32.mrf.mxu1  ;;  %2306 = vmatprep.mubr.msk.f32.mxu0 %vm2486_vm0, %v2485_v1 }
 0x393   : > { %v1302_v46 = vmax.f32 %v1281_v43, 0.0 }
 0x395   : > { %2307 = vmatmul.mubr.msk.f32.gmra.mxu0 %vm420_vm2, %v1302_v46 }
 0x40c   : > { %v1435_v48 = vpop.f32.mrf.mxu0 }
 0x40d   : > { %v1436_v6 = vadd.f32 %v3095_v47, %v1435_v48 }
 0x40e   : > { %v2254_v49 = vpop.f32.mrf.mxu0 }
 0x40f   : > { %v1845_v15 = vmul.f32 -1.442695, %v1436_v6 }
 0x410   : > { %v1440_v35 = vpop.f32.mrf.mxu0 }
 0x411   : > { %2401 = vpow2.f32 %v1845_v15  ;;  %v1441_v32 = vadd.f32 %v3095_v47, %v1440_v35 }
 0x412   : > { %v2257_v51 = vpop.f32.mrf.mxu0 }
 0x413   : > { %v1846_v52 = vmul.f32 -1.442695, %v1441_v32 }
 0x414   : > { %v1445_v1 = vpop.f32.mrf.mxu0 }
 0x415   : > { %2403 = vpow2.f32 %v1846_v52  ;;  %v1446_v8 = vadd.f32 %v3095_v47, %v1445_v1 }
 0x416   : > { %v2260_v38 = vpop.f32.mrf.mxu0 }
 0x417   : > { %v1847_v4 = vmul.f32 -1.442695, %v1446_v8 }
 0x418   : > { %v1450_v53 = vpop.f32.mrf.mxu0 }
 0x419   : > { %2405 = vpow2.f32 %v1847_v4  ;;  %v1451_v44 = vadd.f32 %v3095_v47, %v1450_v53 }
 0x41a   : > { %v2263_v54 = vpop.f32.mrf.mxu0 }
 0x41b   : > { %v1848_v11 = vmul.f32 -1.442695, %v1451_v44 }
 0x41d   : > { %2407 = vpow2.f32 %v1848_v11  ;;  %v1455_v50 = vpop.f32.mrf.mxu0 }
 0x41e   : > { %v2402_v18 = vpop.eup %2401  ;;  %v1456_v55 = vadd.f32 %v3095_v47, %v1455_v50 }
 0x41f   : > { %v1586_v56 = vadd.f32 1.0, %v2402_v18  ;;  %v2266_v14 = vpop.f32.mrf.mxu0 }
 0x420   : > { %v1849_v57 = vmul.f32 -1.442695, %v1456_v55 }
 0x421   : > { %2409 = vrcp.f32 %v1586_v56  ;;  %v1460_v58 = vpop.f32.mrf.mxu0 }
 0x422   : > { %v2404_v59 = vpop.eup %2403  ;;  %2411 = vpow2.f32 %v1849_v57  ;;  %v1461_v17 = vadd.f32 %v3095_v47, %v1460_v58 }
 0x423   : > { %v1587_v60 = vadd.f32 1.0, %v2404_v59  ;;  %v2269_v5 = vpop.f32.mrf.mxu0 }
 0x424   : > { %v1850_v61 = vmul.f32 -1.442695, %v1461_v17 }
 0x425   : > { %2413 = vrcp.f32 %v1587_v60  ;;  %v1465_v19 = vpop.f32.mrf.mxu0 }
 0x426   : > { %v2406_v27 = vpop.eup %2405  ;;  %2415 = vpow2.f32 %v1850_v61  ;;  %v1466_v20 = vadd.f32 %v3095_v47, %v1465_v19 }
 0x427   : > { %v1588_v21 = vadd.f32 1.0, %v2406_v27  ;;  %v2272_v23 = vpop.f32.mrf.mxu0 }
 0x428   : > { %v1851_v25 = vmul.f32 -1.442695, %v1466_v20 }
 0x429   : > { %2417 = vrcp.f32 %v1588_v21  ;;  %v1470_v62 = vpop.f32.mrf.mxu0 }
 0x42a   : > { %v2408_v0 = vpop.eup %2407  ;;  %2419 = vpow2.f32 %v1851_v25  ;;  %v1471_v2 = vadd.f32 %v3095_v47, %v1470_v62 }
 0x42b   : > { %v1589_v3 = vadd.f32 1.0, %v2408_v0  ;;  %v2275_v7 = vpop.f32.mrf.mxu0 }
 0x42c   : > { %v1852_v10 = vmul.f32 -1.442695, %v1471_v2 }
 0x42d   : > { %2421 = vrcp.f32 %v1589_v3  ;;  %v1475_v9 = vpop.f32.mrf.mxu0 }
 0x42e   : > { %v2410_v16 = vpop.eup %2409  ;;  %2423 = vpow2.f32 %v1852_v10  ;;  %v1476_v22 = vadd.f32 %v3095_v47, %v1475_v9 }
 0x42f   : > { %v2412_v28 = vpop.eup %2411  ;;  %1644 = vst.msk [vmem:[%s3110_s20] sm:$0xff] %vm1643_vm5, %v2410_v16  ;;  %v2278_v29 = vpop.f32.mrf.mxu0 }
 0x430   : > { %v1590_v30 = vadd.f32 1.0, %v2412_v28  ;;  %v1853_v31 = vmul.f32 -1.442695, %v1476_v22 }
 0x431   : > { %v1480_v33 = vpop.f32.mrf.mxu0 }
 0x432   : > { %v2414_v34 = vpop.eup %2413  ;;  %2425 = vrcp.f32 %v1590_v30  ;;  %v1481_v24 = vadd.f32 %v3095_v47, %v1480_v33 }
 0x433   : > { %v2416_v36 = vpop.eup %2415  ;;  %1645 = vst.msk [vmem:[%s3110_s20 + $0x8] sm:$0xff] %vm1643_vm5, %v2414_v34  ;;  %2427 = vpow2.f32 %v1853_v31  ;;  %v2281_v37 = vpop.f32.mrf.mxu0 }
 0x434   : > { %v1591_v13 = vadd.f32 1.0, %v2416_v36  ;;  %v1854_v63 = vmul.f32 -1.442695, %v1481_v24 }
 0x435   : > { %v1485_v12 = vpop.f32.mrf.mxu0 }
 0x436   : > { %v2418_v39 = vpop.eup %2417  ;;  %2429 = vrcp.f32 %v1591_v13  ;;  %v1486_v40 = vadd.f32 %v3095_v47, %v1485_v12 }
 0x437   : > { %v2420_v41 = vpop.eup %2419  ;;  %1646 = vst.msk [vmem:[%s3110_s20 + $0x10] sm:$0xff] %vm1643_vm5, %v2418_v39  ;;  %2431 = vpow2.f32 %v1854_v63  ;;  %v2284_v42 = vpop.f32.mrf.mxu0 }
 0x438   : > { %v1592_v26 = vadd.f32 1.0, %v2420_v41  ;;  %v1855_v43 = vmul.f32 -1.442695, %v1486_v40 }
 0x439   : > { %v1490_v45 = vpop.f32.mrf.mxu0 }
 0x43a   : > { %v2422_v46 = vpop.eup %2421  ;;  %2433 = vrcp.f32 %v1592_v26  ;;  %v1491_v48 = vadd.f32 %v3095_v47, %v1490_v45 }
 0x43b   : > { %v2424_v6 = vpop.eup %2423  ;;  %1647 = vst.msk [vmem:[%s3110_s20 + $0x18] sm:$0xff] %vm1643_vm5, %v2422_v46  ;;  %2435 = vpow2.f32 %v1855_v43  ;;  %v2287_v49 = vpop.f32.mrf.mxu0 }
 0x43c   : > { %v1593_v15 = vadd.f32 1.0, %v2424_v6  ;;  %v1856_v35 = vmul.f32 -1.442695, %v1491_v48 }
 0x43d   : > { %v1495_v32 = vpop.f32.mrf.mxu0 }
 0x43e   : > { %2437 = vrcp.f32 %v1593_v15  ;;  %v1496_v51 = vadd.f32 %v3095_v47, %v1495_v32 }
 0x43f   : > { %v2426_v52 = vpop.eup %2425  ;;  %2439 = vpow2.f32 %v1856_v35  ;;  %v2290_v1 = vpop.f32.mrf.mxu0 }
 0x440   : > { %v2428_v8 = vpop.eup %2427  ;;  %1648 = vst.msk [vmem:[%s3110_s20 + $0x20] sm:$0xff] %vm1643_vm5, %v2426_v52  ;;  %v1857_v38 = vmul.f32 -1.442695, %v1496_v51 }
 0x441   : > { %v1594_v4 = vadd.f32 1.0, %v2428_v8  ;;  %v1500_v53 = vpop.f32.mrf.mxu0 }
 0x442   : > { %2441 = vpow2.f32 %v1857_v38  ;;  %v1501_v44 = vadd.f32 %v3095_v47, %v1500_v53 }
 0x443   : > { %v2430_v54 = vpop.eup %2429  ;;  %2443 = vrcp.f32 %v1594_v4  ;;  %v2293_v11 = vpop.f32.mrf.mxu0 }
 0x444   : > { %v2432_v50 = vpop.eup %2431  ;;  %1649 = vst.msk [vmem:[%s3110_s20 + $0x28] sm:$0xff] %vm1643_vm5, %v2430_v54  ;;  %v1858_v18 = vmul.f32 -1.442695, %v1501_v44 }
 0x445   : > { %v1595_v55 = vadd.f32 1.0, %v2432_v50  ;;  %v1505_v56 = vpop.f32.mrf.mxu0 }
 0x446   : > { %2445 = vpow2.f32 %v1858_v18  ;;  %v1506_v14 = vadd.f32 %v3095_v47, %v1505_v56 }
 0x447   : > { %v2434_v57 = vpop.eup %2433  ;;  %2447 = vrcp.f32 %v1595_v55  ;;  %v2296_v58 = vpop.f32.mrf.mxu0 }
 0x448   : > { %v2436_v59 = vpop.eup %2435  ;;  %1650 = vst.msk [vmem:[%s3110_s20 + $0x30] sm:$0xff] %vm1643_vm5, %v2434_v57  ;;  %v1859_v17 = vmul.f32 -1.442695, %v1506_v14 }
 0x449   : > { %v1596_v60 = vadd.f32 1.0, %v2436_v59  ;;  %v1510_v5 = vpop.f32.mrf.mxu0 }
 0x44a   : > { %2449 = vpow2.f32 %v1859_v17  ;;  %v1511_v61 = vadd.f32 %v3095_v47, %v1510_v5 }
 0x44b   : > { %v2438_v19 = vpop.eup %2437  ;;  %2451 = vrcp.f32 %v1596_v60  ;;  %v2299_v27 = vpop.f32.mrf.mxu0 }
 0x44c   : > { %v2440_v20 = vpop.eup %2439  ;;  %1651 = vst.msk [vmem:[%s3110_s20 + $0x38] sm:$0xff] %vm1643_vm5, %v2438_v19  ;;  %v1860_v21 = vmul.f32 -1.442695, %v1511_v61 }
 0x44d   : > { %v1597_v23 = vadd.f32 1.0, %v2440_v20  ;;  %v1515_v25 = vpop.f32.mrf.mxu0 }
 0x44e   : > { %2453 = vpow2.f32 %v1860_v21  ;;  %v1516_v62 = vadd.f32 %v3095_v47, %v1515_v25 }
 0x44f   : > { %v2442_v0 = vpop.eup %2441  ;;  %2455 = vrcp.f32 %v1597_v23  ;;  %v2302_v2 = vpop.f32.mrf.mxu0 }
 0x450   : > { %v2444_v3 = vpop.eup %2443  ;;  %v1598_v7 = vadd.f32 1.0, %v2442_v0  ;;  %v1861_v10 = vmul.f32 -1.442695, %v1516_v62 }
 0x451   : > { %1652 = vst.msk [vmem:[%s3110_s20 + $0x40] sm:$0xff] %vm1643_vm5, %v2444_v3  ;;  %v1520_v9 = vpop.f32.mrf.mxu0 }
 0x452   : > { %2457 = vrcp.f32 %v1598_v7  ;;  %v1521_v16 = vadd.f32 %v3095_v47, %v1520_v9 }
 0x453   : > { %v2446_v22 = vpop.eup %2445  ;;  %2459 = vpow2.f32 %v1861_v10  ;;  %v2305_v28 = vpop.f32.mrf.mxu0 }
 0x454   : > { %v2448_v29 = vpop.eup %2447  ;;  %v1599_v30 = vadd.f32 1.0, %v2446_v22  ;;  %v1862_v31 = vmul.f32 -1.442695, %v1521_v16 }
 0x455   : > { %1653 = vst.msk [vmem:[%s3110_s20 + $0x48] sm:$0xff] %vm1643_vm5, %v2448_v29  ;;  %v1525_v33 = vpop.f32.mrf.mxu0 }
 0x456   : > { %2461 = vrcp.f32 %v1599_v30  ;;  %v1526_v34 = vadd.f32 %v3095_v47, %v1525_v33 }
 0x457   : > { %v2450_v24 = vpop.eup %2449  ;;  %2463 = vpow2.f32 %v1862_v31  ;;  %v2308_v36 = vpop.f32.mrf.mxu0 }
 0x458   : > { %v2452_v37 = vpop.eup %2451  ;;  %v1600_v13 = vadd.f32 1.0, %v2450_v24  ;;  %v1863_v63 = vmul.f32 -1.442695, %v1526_v34 }
 0x459   : > { %1654 = vst.msk [vmem:[%s3110_s20 + $0x50] sm:$0xff] %vm1643_vm5, %v2452_v37 }
 0x45a   : > { %2465 = vrcp.f32 %v1600_v13 }
 0x45b   : > { %v2454_v12 = vpop.eup %2453  ;;  %2467 = vpow2.f32 %v1863_v63 }
 0x45c   : > { %v2456_v39 = vpop.eup %2455  ;;  %v1601_v40 = vadd.f32 1.0, %v2454_v12 }
 0x45d   : > { %1655 = vst.msk [vmem:[%s3110_s20 + $0x58] sm:$0xff] %vm1643_vm5, %v2456_v39 }
 0x45e   : > { %2469 = vrcp.f32 %v1601_v40 }
 0x45f   : > { %v2458_v47 = vpop.eup %2457 }
 0x460   : > { %v2460_v41 = vpop.eup %2459  ;;  %1656 = vst.msk [vmem:[%s3110_s20 + $0x60] sm:$0xff] %vm1643_vm5, %v2458_v47 }
 0x461   : > { %v1602_v42 = vadd.f32 1.0, %v2460_v41 }
 0x463   : > { %v2462_v26 = vpop.eup %2461  ;;  %2471 = vrcp.f32 %v1602_v42 }
 0x464   : > { %v2464_v43 = vpop.eup %2463  ;;  %1657 = vst.msk [vmem:[%s3110_s20 + $0x68] sm:$0xff] %vm1643_vm5, %v2462_v26 }
 0x465   : > { %v1603_v45 = vadd.f32 1.0, %v2464_v43 }
 0x467   : > { %v2466_v46 = vpop.eup %2465  ;;  %2473 = vrcp.f32 %v1603_v45 }
 0x468   : > { %v2468_v48 = vpop.eup %2467  ;;  %1658 = vst.msk [vmem:[%s3110_s20 + $0x70] sm:$0xff] %vm1643_vm5, %v2466_v46 }
 0x469   : > { %v1604_v6 = vadd.f32 1.0, %v2468_v48 }
 0x46b   : > { %v2470_v49 = vpop.eup %2469  ;;  %2475 = vrcp.f32 %v1604_v6 }
 0x46c   : > { %1659 = vst.msk [vmem:[%s3110_s20 + $0x78] sm:$0xff] %vm1643_vm5, %v2470_v49 }
 0x470   : > { %v2472_v15 = vpop.eup %2471 }
 0x471   : > { %1660 = vst.msk [vmem:[%s3110_s20 + $0x80] sm:$0xff] %vm1643_vm5, %v2472_v15 }
 0x474   : > { %v2474_v35 = vpop.eup %2473 }
 0x475   : > { %1661 = vst.msk [vmem:[%s3110_s20 + $0x88] sm:$0xff] %vm1643_vm5, %v2474_v35 }
 0x478   : > { %v2476_v32 = vpop.eup %2475 }
 0x479   : > { %1662 = vst.msk [vmem:[%s3110_s20 + $0x90] sm:$0xff] %vm1643_vm5, %v2476_v32 }
 0x47a PF: > { %s12_s9 = sadd.s32 1, %s2483_s9  }
 0x47b   : > { %p9_p4 = scmp.ge.s32.totalorder %s12_s9, 4  }
 0x47d   :  { %11 = sbr.rel (!%p9_p4) target bundleno = 1 (0x1), region = 58 }

</bundles_post_ra>
